<compile_context>
chip_gen: v7x
topology: tpu7x:2x2x1
jax: 0.10.0
libtpu: 0.0.40
codegen_flags: <defaults>
</compile_context>

<pallas_src>
import functools
import math

import jax
import jax.numpy as jnp
from jax.experimental import pallas as pl
from jax.experimental.pallas import tpu as pltpu


_VMEM_LIMIT = 32 * 1024 * 1024          # safe on v5e / v6e / v7x
_GN_FUSED_MAX_BYTES = 4 * 1024 * 1024   # per-batch slab limit for fused GN


def _round_up(x, m):
    return (x + m - 1) // m * m


# ---------------------------------------------------------------------------
# Tiled matmul + fused bias epilogue (1x1x1 convs, stride-2 conv im2col)
# ---------------------------------------------------------------------------
def _mm_bias_kernel(a_ref, b_ref, bias_ref, o_ref, acc_ref):
    k = pl.program_id(1)

    @pl.when(k == 0)
    def _():
        acc_ref[...] = jnp.zeros_like(acc_ref)

    a = a_ref[...].astype(jnp.bfloat16)          # bf16 MXU operands
    acc_ref[...] += jnp.dot(a, b_ref[...], preferred_element_type=jnp.float32)

    @pl.when(k == pl.num_programs(1) - 1)
    def _():
        o_ref[...] = (acc_ref[...] + bias_ref[...]).astype(o_ref.dtype)


def matmul_bias(a, b, bias=None):
    """a: (M, K) f32/bf16, b: (K, Nc) bf16 (pre-cast), bias: (Nc,) or None."""
    M, K = a.shape
    K2, Nc = b.shape
    assert K == K2
    if bias is None:
        bias = jnp.zeros((Nc,), jnp.float32)
    bias2 = bias.reshape(1, Nc).astype(jnp.float32)

    Mp = _round_up(M, 8)
    if Mp != M:                                   # at most 7 rows of padding
        a = jnp.pad(a, ((0, Mp - M), (0, 0)))

    # Full-K tile when it fits; otherwise split into 128-aligned chunks that
    # divide K exactly (so no garbage enters the reduction).
    tk = K
    if K > 3456:
        for d in range(2, 64):
            if K % d == 0 and (K // d) <= 3456 and (K // d) % 128 == 0:
                tk = K // d
                break
    tm = min(256 if tk > 2048 else 512, Mp)

    grid = (pl.cdiv(Mp, tm), K // tk)
    out = pl.pallas_call(
        _mm_bias_kernel,
        out_shape=jax.ShapeDtypeStruct((Mp, Nc), jnp.float32),
        grid_spec=pltpu.PrefetchScalarGridSpec(
            num_scalar_prefetch=0,
            grid=grid,
            in_specs=[pl.BlockSpec((tm, tk), lambda i, k: (i, k)),
                      pl.BlockSpec((tk, Nc), lambda i, k: (k, 0)),
                      pl.BlockSpec((1, Nc), lambda i, k: (0, 0))],
            out_specs=pl.BlockSpec((tm, Nc), lambda i, k: (i, 0)),
            scratch_shapes=[pltpu.VMEM((tm, Nc), jnp.float32)]),
        compiler_params=pltpu.CompilerParams(
            dimension_semantics=("parallel", "arbitrary"),
            vmem_limit_bytes=_VMEM_LIMIT),
    )(a, b, bias2)
    return out[:M] if Mp != M else out


# ---------------------------------------------------------------------------
# Fused 3x3x3 stride-1 convolution (no im2col): per output depth plane,
# accumulate the 9 in-plane taps from shifted VMEM slices on the MXU.
# ---------------------------------------------------------------------------
def _conv3x3s1_kernel(x_ref, w_ref, o_ref, acc_ref, *, wp, rv, cin):
    i = pl.program_id(2)                          # kernel depth offset (0..2)

    @pl.when(i == 0)
    def _():
        acc_ref[...] = jnp.zeros_like(acc_ref)

    contrib = None
    for jk in range(9):                           # static unroll over (kh, kw)
        off = (jk // 3) * wp + (jk % 3)           # static row offset
        xin = x_ref[0, 0, pl.ds(off, rv), :]      # (rv, Cin)
        wjk = w_ref[0, jk]                        # (Cin, Cout) bf16
        if cin == 1:                              # first conv: outer product
            term = xin.astype(jnp.float32) * wjk.astype(jnp.float32)
        else:
            term = jnp.dot(xin.astype(jnp.bfloat16), wjk,
                           preferred_element_type=jnp.float32)
        contrib = term if contrib is None else contrib + term
    acc_ref[...] += contrib

    @pl.when(i == pl.num_programs(2) - 1)
    def _():
        o_ref[0, 0, pl.ds(0, rv), :] = acc_ref[...].astype(o_ref.dtype)


def conv3x3_s1(x, w):
    """x: (N, D, H, W, C) f32, w: (3, 3, 3, Cin, Cout) bf16 -> f32 output."""
    N, D, H, W, C = x.shape
    Cout = w.shape[-1]
    Dp, Hp, Wp = D + 2, H + 2, W + 2
    Rv = (H - 1) * Wp + W                         # valid virtual output rows
    xp = jnp.pad(x, ((0, 0), (1, 1), (1, 1), (1, 1), (0, 0)))
    xp = xp.reshape(N, Dp, Hp * Wp, C)
    wk = w.reshape(3, 9, C, Cout)

    out = pl.pallas_call(
        functools.partial(_conv3x3s1_kernel, wp=Wp, rv=Rv, cin=C),
        out_shape=jax.ShapeDtypeStruct((N, D, Hp * Wp, Cout), jnp.float32),
        grid_spec=pltpu.PrefetchScalarGridSpec(
            num_scalar_prefetch=0,
            grid=(N, D, 3),
            in_specs=[pl.BlockSpec((1, 1, Hp * Wp, C),
                                   lambda n, d, i: (n, d + i, 0, 0)),
                      pl.BlockSpec((1, 9, C, Cout),
                                   lambda n, d, i: (i, 0, 0, 0))],
            out_specs=pl.BlockSpec((1, 1, Hp * Wp, Cout),
                                   lambda n, d, i: (n, d, 0, 0)),
            scratch_shapes=[pltpu.VMEM((Rv, Cout), jnp.float32)]),
        compiler_params=pltpu.CompilerParams(
            dimension_semantics=("parallel", "parallel", "arbitrary"),
            vmem_limit_bytes=_VMEM_LIMIT),
    )(xp, wk)

    out = out.reshape(N, D, Hp, Wp, Cout)[:, :, :H, :W, :]
    return out


def conv3x3_s2(x, w):
    """Stride-2 3x3x3 conv: small im2col (27 views at 1/8 res) + Pallas matmul."""
    N, D, H, W, C = x.shape
    Cout = w.shape[-1]
    xp = jnp.pad(x, ((0, 0), (1, 1), (1, 1), (1, 1), (0, 0)))
    Do, Ho, Wo = (D - 1) // 2 + 1, (H - 1) // 2 + 1, (W - 1) // 2 + 1
    views = []
    for i in range(3):
        for j in range(3):
            for k in range(3):
                views.append(xp[:, i:i + 2 * Do:2, j:j + 2 * Ho:2,
                                k:k + 2 * Wo:2, :])
    pat = jnp.stack(views, axis=4)                 # (N, Do, Ho, Wo, 27, C)
    pat = pat.reshape(N * Do * Ho * Wo, 27 * C).astype(jnp.bfloat16)
    wf = w.reshape(27 * C, Cout)
    out = matmul_bias(pat, wf, None)
    return out.reshape(N, Do, Ho, Wo, Cout)


def conv1x1(x, w, bias=None, stride=(1, 1, 1)):
    """1x1x1 conv as a Pallas matmul with fused bias; stride via pre-slice."""
    if stride != (1, 1, 1):
        x = x[:, ::stride[0], ::stride[1], ::stride[2], :]
    N, D, H, W, C = x.shape
    Cout = w.shape[-1]
    out = matmul_bias(x.reshape(-1, C), w, bias)
    return out.reshape(N, D, H, W, Cout)


# ---------------------------------------------------------------------------
# Fused GroupNorm(16) + ReLU, channels-last.
# ---------------------------------------------------------------------------
def _gn_relu_fused_kernel(x_ref, g_ref, b_ref, m_ref, mt_ref, o_ref, *, cnt):
    x = x_ref[0].astype(jnp.float32)               # (S, C)
    s1 = jnp.sum(x, axis=0, keepdims=True)         # per-channel sums (1, C)
    s2 = jnp.sum(x * x, axis=0, keepdims=True)
    gmap = m_ref[...]                              # (C, G) one-hot group map
    gmap_t = mt_ref[...]                           # (G, C)
    mean = jnp.dot(s1, gmap, preferred_element_type=jnp.float32) / cnt   # (1, G)
    ex2 = jnp.dot(s2, gmap, preferred_element_type=jnp.float32) / cnt
    inv = jax.lax.rsqrt(ex2 - mean * mean + 1e-5)
    inv_c = jnp.dot(inv, gmap_t, preferred_element_type=jnp.float32)     # (1, C)
    mean_c = jnp.dot(mean, gmap_t, preferred_element_type=jnp.float32)
    scale = g_ref[...] * inv_c
    shift = b_ref[...] - mean_c * scale
    o_ref[0] = jnp.maximum(x * scale + shift, 0.0)


def _gn_stats_kernel(x_ref, o_ref, acc_ref, *, s_total, ts):
    t = pl.program_id(1)

    @pl.when(t == 0)
    def _():
        acc_ref[...] = jnp.zeros_like(acc_ref)

    x = x_ref[0].astype(jnp.float32)                              # (ts, C)
    row = jax.lax.broadcasted_iota(jnp.int32, x.shape, 0) + t * ts
    x = jnp.where(row < s_total, x, 0.0)
    s1 = jnp.sum(x, axis=0, keepdims=True)
    s2 = jnp.sum(x * x, axis=0, keepdims=True)
    acc_ref[...] += jnp.concatenate([s1, s2], axis=0)             # (2, C)

    @pl.when(t == pl.num_programs(1) - 1)
    def _():
        o_ref[0] = acc_ref[...]


def _gn_apply_kernel(x_ref, sc_ref, sh_ref, o_ref):
    x = x_ref[0].astype(jnp.float32)
    o_ref[0] = jnp.maximum(x * sc_ref[0] + sh_ref[0], 0.0)


def _group_norm_relu_tiled(xr, gamma, beta, G):
    """Two-pass tiled GN+ReLU for slabs too large for a single VMEM block."""
    N, S, C = xr.shape
    Cg = C // G
    ts = min(1024, _round_up(S, 8))
    grid = (N, pl.cdiv(S, ts))

    sums = pl.pallas_call(
        functools.partial(_gn_stats_kernel, s_total=S, ts=ts),
        out_shape=jax.ShapeDtypeStruct((N, 2, C), jnp.float32),
        grid_spec=pltpu.PrefetchScalarGridSpec(
            num_scalar_prefetch=0,
            grid=grid,
            in_specs=[pl.BlockSpec((1, ts, C), lambda n, t: (n, t, 0))],
            out_specs=pl.BlockSpec((1, 2, C), lambda n, t: (n, 0, 0)),
            scratch_shapes=[pltpu.VMEM((2, C), jnp.float32)]),
        compiler_params=pltpu.CompilerParams(
            dimension_semantics=("parallel", "arbitrary"),
            vmem_limit_bytes=_VMEM_LIMIT),
    )(xr)

    cnt = float(S * Cg)
    s1 = sums[:, 0, :].reshape(N, G, Cg)
    s2 = sums[:, 1, :].reshape(N, G, Cg)
    mean = jnp.sum(s1, axis=2, keepdims=True) / cnt
    ex2 = jnp.sum(s2, axis=2, keepdims=True) / cnt
    inv = jax.lax.rsqrt(ex2 - mean * mean + 1e-5)
    g2 = gamma.reshape(1, G, Cg)
    b2 = beta.reshape(1, G, Cg)
    scale = (g2 * inv).reshape(N, 1, C)
    shift = (b2 - mean * g2 * inv).reshape(N, 1, C)

    out = pl.pallas_call(
        _gn_apply_kernel,
        out_shape=jax.ShapeDtypeStruct((N, S, C), jnp.float32),
        grid_spec=pltpu.PrefetchScalarGridSpec(
            num_scalar_prefetch=0,
            grid=grid,
            in_specs=[pl.BlockSpec((1, ts, C), lambda n, t: (n, t, 0)),
                      pl.BlockSpec((1, 1, C), lambda n, t: (n, 0, 0)),
                      pl.BlockSpec((1, 1, C), lambda n, t: (n, 0, 0))],
            out_specs=pl.BlockSpec((1, ts, C), lambda n, t: (n, t, 0))),
        compiler_params=pltpu.CompilerParams(
            dimension_semantics=("parallel", "parallel"),
            vmem_limit_bytes=_VMEM_LIMIT),
    )(xr, scale, shift)
    return out


def group_norm_relu(x, gamma, beta, groups=16, force_tiled=False):
    N, D, H, W, C = x.shape
    S = D * H * W
    G = groups
    Cg = C // G
    xr = x.reshape(N, S, C)

    if force_tiled or S * C * 4 > _GN_FUSED_MAX_BYTES:
        out = _group_norm_relu_tiled(xr, gamma, beta, G)
    else:
        gmap = jnp.repeat(jnp.eye(G, dtype=jnp.float32), Cg, axis=0)  # (C, G)
        gmap_t = jnp.transpose(gmap)                                  # (G, C)
        out = pl.pallas_call(
            functools.partial(_gn_relu_fused_kernel, cnt=float(S * Cg)),
            out_shape=jax.ShapeDtypeStruct((N, S, C), jnp.float32),
            grid_spec=pltpu.PrefetchScalarGridSpec(
                num_scalar_prefetch=0,
                grid=(N,),
                in_specs=[pl.BlockSpec((1, S, C), lambda n: (n, 0, 0)),
                          pl.BlockSpec((1, C), lambda n: (0, 0)),
                          pl.BlockSpec((1, C), lambda n: (0, 0)),
                          pl.BlockSpec((C, G), lambda n: (0, 0)),
                          pl.BlockSpec((G, C), lambda n: (0, 0))],
                out_specs=pl.BlockSpec((1, S, C), lambda n: (n, 0, 0))),
            compiler_params=pltpu.CompilerParams(
                dimension_semantics=("parallel",),
                vmem_limit_bytes=_VMEM_LIMIT),
        )(xr, gamma.reshape(1, C), beta.reshape(1, C), gmap, gmap_t)
    return out.reshape(N, D, H, W, C)


# ---------------------------------------------------------------------------
# Trilinear x2 upsampling (align_corners=False) via static slices, fused add.
# ---------------------------------------------------------------------------
def _upsample_axis_x2(x, axis):
    n = x.shape[axis]
    first = jax.lax.slice_in_dim(x, 0, 1, axis=axis)
    last = jax.lax.slice_in_dim(x, n - 1, n, axis=axis)
    left = jnp.concatenate(
        [first, jax.lax.slice_in_dim(x, 0, n - 1, axis=axis)], axis=axis)
    right = jnp.concatenate(
        [jax.lax.slice_in_dim(x, 1, n, axis=axis), last], axis=axis)
    even = 0.75 * x + 0.25 * left
    odd = 0.75 * x + 0.25 * right
    out = jnp.stack([even, odd], axis=axis + 1)
    new_shape = x.shape[:axis] + (2 * n,) + x.shape[axis + 1:]
    return out.reshape(new_shape)


def upsample_add(x, skip):
    x = _upsample_axis_x2(x, 1)
    x = _upsample_axis_x2(x, 2)
    x = _upsample_axis_x2(x, 3)
    return x + skip


# ---------------------------------------------------------------------------
# Fused dynamic heads: three grouped 1x1x1 layers + ReLU in one kernel.
# ---------------------------------------------------------------------------
def _heads_kernel(x_ref, w1_ref, b1_ref, w2_ref, b2_ref, w3_ref, b3_ref, o_ref):
    x = x_ref[0]                                          # (8, ts) f32
    h = jnp.dot(w1_ref[0], x, preferred_element_type=jnp.float32) + b1_ref[0]
    h = jnp.maximum(h, 0.0)
    h = jnp.dot(w2_ref[0], h, preferred_element_type=jnp.float32) + b2_ref[0]
    h = jnp.maximum(h, 0.0)
    o_ref[0] = jnp.dot(w3_ref[0], h, preferred_element_type=jnp.float32) + b3_ref[0]


def heads_forward_fused(feat, w1, b1, w2, b2, w3, b3):
    """feat: (N, 8, S); w1/w2: (N,8,8); w3: (N,2,8); biases (N,8,1)/(N,2,1)."""
    N, _, S = feat.shape
    ts = min(4096, _round_up(S, 128))
    grid = (N, pl.cdiv(S, ts))
    out = pl.pallas_call(
        _heads_kernel,
        out_shape=jax.ShapeDtypeStruct((N, 2, S), jnp.float32),
        grid_spec=pltpu.PrefetchScalarGridSpec(
            num_scalar_prefetch=0,
            grid=grid,
            in_specs=[pl.BlockSpec((1, 8, ts), lambda n, s: (n, 0, s)),
                      pl.BlockSpec((1, 8, 8), lambda n, s: (n, 0, 0)),
                      pl.BlockSpec((1, 8, 1), lambda n, s: (n, 0, 0)),
                      pl.BlockSpec((1, 8, 8), lambda n, s: (n, 0, 0)),
                      pl.BlockSpec((1, 8, 1), lambda n, s: (n, 0, 0)),
                      pl.BlockSpec((1, 2, 8), lambda n, s: (n, 0, 0)),
                      pl.BlockSpec((1, 2, 1), lambda n, s: (n, 0, 0))],
            out_specs=pl.BlockSpec((1, 2, ts), lambda n, s: (n, 0, s))),
        compiler_params=pltpu.CompilerParams(
            dimension_semantics=("parallel", "parallel"),
            vmem_limit_bytes=_VMEM_LIMIT),
    )(feat, w1, b1, w2, b2, w3, b3)
    return out


# ---------------------------------------------------------------------------
# NoBottleneck residual block / layers (channels-last)
# ---------------------------------------------------------------------------
def run_block(x, p, stride):
    out = group_norm_relu(x, p['gn1_g'], p['gn1_b'])
    if stride == (1, 1, 1):
        out = conv3x3_s1(out, p['conv1_w'])
    else:
        out = conv3x3_s2(out, p['conv1_w'])
    out = group_norm_relu(out, p['gn2_g'], p['gn2_b'])
    out = conv3x3_s1(out, p['conv2_w'])
    if 'down_w' in p:
        r = group_norm_relu(x, p['down_gn_g'], p['down_gn_b'])
        residual = conv1x1(r, p['down_w'], stride=stride)
    else:
        residual = x
    return out + residual


def run_layer(x, blocks, stride):
    x = run_block(x, blocks[0], stride)
    for bp in blocks[1:]:
        x = run_block(x, bp, (1, 1, 1))
    return x


# ---------------------------------------------------------------------------
# Parameter initialization (weights pre-laid-out / pre-cast once)
# ---------------------------------------------------------------------------
class KeyGen:
    def __init__(self, key):
        self.key = key

    def __call__(self):
        self.key, sub = jax.random.split(self.key)
        return sub


def conv3_weight(kg, cin, cout):
    fan_in = cin * 27
    w = jax.random.normal(kg(), (3, 3, 3, cin, cout), jnp.float32)
    return (w / math.sqrt(fan_in)).astype(jnp.bfloat16)


def conv1_weight(kg, cin, cout):
    w = jax.random.normal(kg(), (cin, cout), jnp.float32)
    return (w / math.sqrt(cin)).astype(jnp.bfloat16)


def init_block(kg, inp, planes, downsample):
    p = {
        'gn1_g': jnp.ones((inp,), jnp.float32),
        'gn1_b': jnp.zeros((inp,), jnp.float32),
        'conv1_w': conv3_weight(kg, inp, planes),
        'gn2_g': jnp.ones((planes,), jnp.float32),
        'gn2_b': jnp.zeros((planes,), jnp.float32),
        'conv2_w': conv3_weight(kg, planes, planes),
    }
    if downsample:
        p['down_gn_g'] = jnp.ones((inp,), jnp.float32)
        p['down_gn_b'] = jnp.zeros((inp,), jnp.float32)
        p['down_w'] = conv1_weight(kg, inp, planes)
    return p


def init_layer(kg, inp, planes, blocks, stride):
    downsample = (stride != (1, 1, 1)) or (inp != planes)
    layer = [init_block(kg, inp, planes, downsample)]
    for _ in range(1, blocks):
        layer.append(init_block(kg, planes, planes, False))
    return layer


def init_params(seed, layers):
    kg = KeyGen(jax.random.PRNGKey(seed))
    P = {}
    P['conv1_w'] = conv3_weight(kg, 1, 32)
    P['layer0'] = init_layer(kg, 32, 32, layers[0], (1, 1, 1))
    P['layer1'] = init_layer(kg, 32, 64, layers[1], (2, 2, 2))
    P['layer2'] = init_layer(kg, 64, 128, layers[2], (2, 2, 2))
    P['layer3'] = init_layer(kg, 128, 256, layers[3], (2, 2, 2))
    P['layer4'] = init_layer(kg, 256, 256, layers[4], (2, 2, 2))
    P['fusion_gn_g'] = jnp.ones((256,), jnp.float32)
    P['fusion_gn_b'] = jnp.zeros((256,), jnp.float32)
    P['fusion_w'] = conv1_weight(kg, 256, 256)
    P['x8'] = init_layer(kg, 256, 128, 1, (1, 1, 1))
    P['x4'] = init_layer(kg, 128, 64, 1, (1, 1, 1))
    P['x2'] = init_layer(kg, 64, 32, 1, (1, 1, 1))
    P['x1'] = init_layer(kg, 32, 32, 1, (1, 1, 1))
    P['precls_gn_g'] = jnp.ones((32,), jnp.float32)
    P['precls_gn_b'] = jnp.zeros((32,), jnp.float32)
    P['precls_w'] = conv1_weight(kg, 32, 8)
    P['precls_b'] = 0.01 * jax.random.normal(kg(), (8,), jnp.float32)
    P['gap_gn_g'] = jnp.ones((256,), jnp.float32)
    P['gap_gn_b'] = jnp.zeros((256,), jnp.float32)
    P['ctrl_w'] = (jax.random.normal(kg(), (262, 162), jnp.float32)
                   / math.sqrt(262.0))
    P['ctrl_b'] = 0.01 * jax.random.normal(kg(), (162,), jnp.float32)
    return P


# ---------------------------------------------------------------------------
# Full unet3D forward (training path of the PyTorch module)
# ---------------------------------------------------------------------------
def unet3d_forward(P, x, task_id):
    # NCDHW -> channels-last NDHWC
    x = jnp.transpose(x, (0, 2, 3, 4, 1))

    x = conv3x3_s1(x, P['conv1_w'])
    x = run_layer(x, P['layer0'], (1, 1, 1)); skip0 = x
    x = run_layer(x, P['layer1'], (2, 2, 2)); skip1 = x
    x = run_layer(x, P['layer2'], (2, 2, 2)); skip2 = x
    x = run_layer(x, P['layer3'], (2, 2, 2)); skip3 = x
    x = run_layer(x, P['layer4'], (2, 2, 2))

    # fusionConv
    x = group_norm_relu(x, P['fusion_gn_g'], P['fusion_gn_b'])
    x = conv1x1(x, P['fusion_w'])

    # GAP branch
    xg = group_norm_relu(x, P['gap_gn_g'], P['gap_gn_b'])
    N, D8, H8, W8, C8 = xg.shape
    x_feat = jnp.mean(xg.reshape(N, -1, C8), axis=1)          # (N, 256)

    # decoder
    x = upsample_add(x, skip3); x = run_layer(x, P['x8'], (1, 1, 1))
    x = upsample_add(x, skip2); x = run_layer(x, P['x4'], (1, 1, 1))
    x = upsample_add(x, skip1); x = run_layer(x, P['x2'], (1, 1, 1))
    x = upsample_add(x, skip0); x = run_layer(x, P['x1'], (1, 1, 1))

    # precls + head inputs
    h = group_norm_relu(x, P['precls_gn_g'], P['precls_gn_b'])
    head = conv1x1(h, P['precls_w'], bias=P['precls_b'])      # (N, D, H, W, 8)
    Nn, D, H, W, _ = head.shape
    S = D * H * W
    feat = jnp.transpose(head.reshape(Nn, S, 8), (0, 2, 1))   # (N, 8, S)

    # dynamic parameter controller (tiny matmul: plain XLA)
    task_enc = jax.nn.one_hot(task_id, 6, dtype=jnp.float32)  # (N, 6)
    x_cond = jnp.concatenate([x_feat, task_enc], axis=1)      # (N, 262)
    dyn = jnp.dot(x_cond, P['ctrl_w']) + P['ctrl_b'][None, :]  # (N, 162)

    w1 = dyn[:, 0:64].reshape(Nn, 8, 8)
    w2 = dyn[:, 64:128].reshape(Nn, 8, 8)
    w3 = dyn[:, 128:144].reshape(Nn, 2, 8)
    b1 = dyn[:, 144:152].reshape(Nn, 8, 1)
    b2 = dyn[:, 152:160].reshape(Nn, 8, 1)
    b3 = dyn[:, 160:162].reshape(Nn, 2, 1)

    logits = heads_forward_fused(feat, w1, b1, w2, b2, w3, b3)  # (N, 2, S)
    return logits.reshape(Nn, 2, D, H, W)


if __name__ == "__main__":
    key = jax.random.PRNGKey(0)
    kx, kt = jax.random.split(key)

    layers_cfg = [1, 2, 2, 2, 2]                  # DoDNet vanilla config
    params = init_params(seed=0, layers=layers_cfg)

    N, D, H, W = 2, 16, 16, 16                    # spatial >= 16 (4 stride-2 stages)
    x = jax.random.normal(kx, (N, 1, D, H, W), jnp.float32)
    task_id = jnp.array([0, 3], dtype=jnp.int32)

    # Consistency check: tiled two-pass GroupNorm path vs fused single-pass path.
    xc = jax.random.normal(kt, (1, 8, 8, 8, 32), jnp.float32)
    g = jnp.linspace(0.5, 1.5, 32).astype(jnp.float32)
    b = jnp.linspace(-0.2, 0.2, 32).astype(jnp.float32)
    a1 = group_norm_relu(xc, g, b)
    a2 = group_norm_relu(xc, g, b, force_tiled=True)
    assert float(jnp.max(jnp.abs(a1 - a2))) < 1e-3

    fwd = jax.jit(unet3d_forward)
    logits = fwd(params, x, task_id)
    logits = jax.block_until_ready(logits)
    assert logits.shape == (N, 2, D, H, W), logits.shape
    print("KERNEL_OK")
</pallas_src>

<mosaic_0001>
module attributes {stable_mosaic.version = 11 : i64} {
  func.func @_gn_relu_fused_kernel(%arg0: i32, %arg1: memref<1x512x32xf32, #tpu.memory_space<vmem>>, %arg2: memref<1x32xf32, #tpu.memory_space<vmem>>, %arg3: memref<1x32xf32, #tpu.memory_space<vmem>>, %arg4: memref<32x16xf32, #tpu.memory_space<vmem>>, %arg5: memref<16x32xf32, #tpu.memory_space<vmem>>, %arg6: memref<1x512x32xf32, #tpu.memory_space<vmem>>) attributes {dimension_semantics = [#tpu.dimension_semantics<parallel>], iteration_bounds = array<i64: 1>, scalar_prefetch = 0 : i64, scratch_operands = 0 : i64, tpu.core_type = #tpu.core_type<tc>, window_params = [{transform_indices = @transform_0, window_bounds = array<i64: 1, 512, 32>}, {pipeline_mode = #tpu.pipeline_mode<synchronous>, transform_indices = @transform_1, window_bounds = array<i64: 1, 32>}, {pipeline_mode = #tpu.pipeline_mode<synchronous>, transform_indices = @transform_2, window_bounds = array<i64: 1, 32>}, {pipeline_mode = #tpu.pipeline_mode<synchronous>, transform_indices = @transform_3, window_bounds = array<i64: 32, 16>}, {pipeline_mode = #tpu.pipeline_mode<synchronous>, transform_indices = @transform_4, window_bounds = array<i64: 16, 32>}, {transform_indices = @transform_5, window_bounds = array<i64: 1, 512, 32>}]} {
    %c0 = arith.constant 0 : index
    %c0_0 = arith.constant 0 : index
    %c0_1 = arith.constant 0 : index
    %0 = vector.load %arg1[%c0, %c0_0, %c0_1] : memref<1x512x32xf32, #tpu.memory_space<vmem>>, vector<1x512x32xf32>
    %1 = vector.shape_cast %0 : vector<1x512x32xf32> to vector<512x32xf32>
    %cst = arith.constant dense<0.000000e+00> : vector<32xf32>
    %2 = vector.multi_reduction <add>, %1, %cst [0] : vector<512x32xf32> to vector<32xf32>
    %3 = vector.shape_cast %2 : vector<32xf32> to vector<1x32xf32>
    %4 = arith.mulf %1, %1 : vector<512x32xf32>
    %cst_2 = arith.constant dense<0.000000e+00> : vector<32xf32>
    %5 = vector.multi_reduction <add>, %4, %cst_2 [0] : vector<512x32xf32> to vector<32xf32>
    %6 = vector.shape_cast %5 : vector<32xf32> to vector<1x32xf32>
    %c0_3 = arith.constant 0 : index
    %c0_4 = arith.constant 0 : index
    %7 = vector.load %arg4[%c0_3, %c0_4] : memref<32x16xf32, #tpu.memory_space<vmem>>, vector<32x16xf32>
    %c0_5 = arith.constant 0 : index
    %c0_6 = arith.constant 0 : index
    %8 = vector.load %arg5[%c0_5, %c0_6] : memref<16x32xf32, #tpu.memory_space<vmem>>, vector<16x32xf32>
    %cst_7 = arith.constant dense<0.000000e+00> : vector<1x16xf32>
    %9 = tpu.matmul %3, %7, %cst_7 {dimension_numbers = #tpu.dot_dimension_numbers<[1], [0], [0], [1], [0, 0, 1, 1], [], []>} : vector<1x32xf32>, vector<32x16xf32>, vector<1x16xf32> -> vector<1x16xf32>
    %cst_8 = arith.constant 1.024000e+03 : f32
    %10 = vector.broadcast %cst_8 : f32 to vector<1x16xf32>
    %11 = arith.divf %9, %10 : vector<1x16xf32>
    %cst_9 = arith.constant dense<0.000000e+00> : vector<1x16xf32>
    %12 = tpu.matmul %6, %7, %cst_9 {dimension_numbers = #tpu.dot_dimension_numbers<[1], [0], [0], [1], [0, 0, 1, 1], [], []>} : vector<1x32xf32>, vector<32x16xf32>, vector<1x16xf32> -> vector<1x16xf32>
    %cst_10 = arith.constant 1.024000e+03 : f32
    %13 = vector.broadcast %cst_10 : f32 to vector<1x16xf32>
    %14 = arith.divf %12, %13 : vector<1x16xf32>
    %15 = arith.mulf %11, %11 : vector<1x16xf32>
    %16 = arith.subf %14, %15 : vector<1x16xf32>
    %cst_11 = arith.constant 9.99999974E-6 : f32
    %17 = vector.broadcast %cst_11 : f32 to vector<1x16xf32>
    %18 = arith.addf %16, %17 : vector<1x16xf32>
    %19 = math.rsqrt %18 : vector<1x16xf32>
    %cst_12 = arith.constant dense<0.000000e+00> : vector<1x32xf32>
    %20 = tpu.matmul %19, %8, %cst_12 {dimension_numbers = #tpu.dot_dimension_numbers<[1], [0], [0], [1], [0, 0, 1, 1], [], []>} : vector<1x16xf32>, vector<16x32xf32>, vector<1x32xf32> -> vector<1x32xf32>
    %cst_13 = arith.constant dense<0.000000e+00> : vector<1x32xf32>
    %21 = tpu.matmul %11, %8, %cst_13 {dimension_numbers = #tpu.dot_dimension_numbers<[1], [0], [0], [1], [0, 0, 1, 1], [], []>} : vector<1x16xf32>, vector<16x32xf32>, vector<1x32xf32> -> vector<1x32xf32>
    %c0_14 = arith.constant 0 : index
    %c0_15 = arith.constant 0 : index
    %22 = vector.load %arg2[%c0_14, %c0_15] : memref<1x32xf32, #tpu.memory_space<vmem>>, vector<1x32xf32>
    %23 = arith.mulf %22, %20 : vector<1x32xf32>
    %c0_16 = arith.constant 0 : index
    %c0_17 = arith.constant 0 : index
    %24 = vector.load %arg3[%c0_16, %c0_17] : memref<1x32xf32, #tpu.memory_space<vmem>>, vector<1x32xf32>
    %25 = arith.mulf %21, %23 : vector<1x32xf32>
    %26 = arith.subf %24, %25 : vector<1x32xf32>
    %27 = vector.broadcast %23 : vector<1x32xf32> to vector<512x32xf32>
    %28 = arith.mulf %1, %27 : vector<512x32xf32>
    %29 = vector.broadcast %26 : vector<1x32xf32> to vector<512x32xf32>
    %30 = arith.addf %28, %29 : vector<512x32xf32>
    %cst_18 = arith.constant 0.000000e+00 : f32
    %31 = vector.broadcast %cst_18 : f32 to vector<512x32xf32>
    %32 = arith.maximumf %30, %31 : vector<512x32xf32>
    %c0_19 = arith.constant 0 : index
    %c0_20 = arith.constant 0 : index
    %c0_21 = arith.constant 0 : index
    %33 = vector.load %arg6[%c0_19, %c0_20, %c0_21] : memref<1x512x32xf32, #tpu.memory_space<vmem>>, vector<1x512x32xf32>
    %34 = vector.shape_cast %33 : vector<1x512x32xf32> to vector<512x32xf32>
    %35 = vector.shape_cast %32 : vector<512x32xf32> to vector<1x512x32xf32>
    tpu.vector_store %arg6[%c0_19, %c0_20, %c0_21], %35 {strides = array<i32>} : memref<1x512x32xf32, #tpu.memory_space<vmem>>, vector<1x512x32xf32>,
    return
  }
  func.func @transform_0(%arg0: i32) -> (i32, i32, i32) {
    %c0_i32 = arith.constant 0 : i32
    %c0_i32_0 = arith.constant 0 : i32
    %c0_i32_1 = arith.constant 0 : i32
    return %arg0, %c0_i32, %c0_i32_0 : i32, i32, i32
  }
  func.func @transform_1(%arg0: i32) -> (i32, i32) {
    %c0_i32 = arith.constant 0 : i32
    %c0_i32_0 = arith.constant 0 : i32
    %c0_i32_1 = arith.constant 0 : i32
    return %c0_i32, %c0_i32_0 : i32, i32
  }
  func.func @transform_2(%arg0: i32) -> (i32, i32) {
    %c0_i32 = arith.constant 0 : i32
    %c0_i32_0 = arith.constant 0 : i32
    %c0_i32_1 = arith.constant 0 : i32
    return %c0_i32, %c0_i32_0 : i32, i32
  }
  func.func @transform_3(%arg0: i32) -> (i32, i32) {
    %c0_i32 = arith.constant 0 : i32
    %c0_i32_0 = arith.constant 0 : i32
    %c0_i32_1 = arith.constant 0 : i32
    return %c0_i32, %c0_i32_0 : i32, i32
  }
  func.func @transform_4(%arg0: i32) -> (i32, i32) {
    %c0_i32 = arith.constant 0 : i32
    %c0_i32_0 = arith.constant 0 : i32
    %c0_i32_1 = arith.constant 0 : i32
    return %c0_i32, %c0_i32_0 : i32, i32
  }
  func.func @transform_5(%arg0: i32) -> (i32, i32, i32) {
    %c0_i32 = arith.constant 0 : i32
    %c0_i32_0 = arith.constant 0 : i32
    %c0_i32_1 = arith.constant 0 : i32
    return %arg0, %c0_i32, %c0_i32_0 : i32, i32, i32
  }
}

</mosaic_0001>

<bundles_post_ra>
// kernel: tpu_custom_call.1
= control target key start
LH: loop header
LB: loop body
LE: loop exit
PB: predicated region body
PF: predicated region fallthrough
CT: control target
= control target key end

     0   :  { %vm84_vm0 = vcmask 261120   ;;  %v1077_v0 = vmov 0.0|0.0   ;;  %vm1078_vm1 = vmmov 0   ;;  %v2639_v6 = vmov 0.0   ;;  %s2633_s3 = inlined_call_operand.vmem [shape: f32[32,16], index: 3, kind: input, shape index: {}]   ;;  %s2634_s0 = inlined_call_operand.vmem [shape: f32[1,512,32], index: 0, kind: input, shape index: {}]   ;;  %s2635_s4 = inlined_call_operand.vmem [shape: f32[16,32], index: 4, kind: input, shape index: {}]   ;;  %s2636_s1 = inlined_call_operand.vmem [shape: f32[1,32], index: 1, kind: input, shape index: {}]   ;;  %s2637_s2 = inlined_call_operand.vmem [shape: f32[1,32], index: 2, kind: input, shape index: {}]   ;;  %s2638_s5 = inlined_call_operand.vmem [shape: f32[1,512,32], index: 5, kind: output, shape index: {}]  }
   0x1   :  { %1054 = vmatprep.subr.bf16.mxu0 %v1077_v0  ;;  %v415_v1 = vld [vmem:[%s2633_s3] sm:$0xff]  ;;  %v416_v2 = vld [vmem:[%s2633_s3 + $0x8] sm:$0xff]  ;;  %1060 = vmatprep.subr.bf16.mxu1 %v1077_v0  ;;  %v417_v3 = vld [vmem:[%s2633_s3 + $0x10] sm:$0xff]  ;;  %vm574_vm2 = vcmask 130048  }
   0x2   :  { %v1055_v4 = vpack.c.bf16 %v416_v2, %v415_v1  ;;  %v418_v5 = vld [vmem:[%s2633_s3 + $0x18] sm:$0xff]  ;;  %1026 = vmatprep.mubr.msk.f32.mxu0 %vm1078_vm1, %v2639_v6  ;;  %v1127_v7 = vld [vmem:[%s2634_s0] sm:$0xff]  ;;  %v1132_v8 = vld [vmem:[%s2634_s0 + $0x8] sm:$0xff]  ;;  %1037 = vmatprep.mubr.msk.f32.mxu1 %vm1078_vm1, %v2639_v6 }
   0x3   :  { %v1139_v9 = vld [vmem:[%s2634_s0 + $0x10] sm:$0xff]  ;;  %v1144_v10 = vld [vmem:[%s2634_s0 + $0x18] sm:$0xff]  ;;  %v85_v11 = vsel %vm84_vm0, %v1127_v7, 0.0  ;;  %v86_v12 = vsel %vm84_vm0, %v1132_v8, 0.0  ;;  %v1058_v13 = vpack.c.bf16 %v418_v5, %v417_v3  ;;  %v1153_v14 = vld [vmem:[%s2634_s0 + $0x20] sm:$0xff]  ;;  %v218_v63 = vmul.f32 %v1127_v7, %v1127_v7 }
   0x4   :  { %1056 = vmatpush3.bf16.msra.mxu0 %v1055_v4  ;;  %1062 = vmatpush3.bf16.msra.mxu1 %v1055_v4  ;;  %v87_v15 = vadd.f32 %v86_v12, %v85_v11  ;;  %v88_v16 = vsel %vm84_vm0, %v1139_v9, 0.0  ;;  %v90_v17 = vsel %vm84_vm0, %v1144_v10, 0.0  ;;  %v1162_v18 = vld [vmem:[%s2634_s0 + $0x28] sm:$0xff]  ;;  %v92_v20 = vsel %vm84_vm0, %v1153_v14, 0.0  ;;  %v1169_v21 = vld [vmem:[%s2634_s0 + $0x30] sm:$0xff]  ;;  %v1176_v24 = vld [vmem:[%s2634_s0 + $0x38] sm:$0xff] }
   0x5   :  { %1057 = vmatprep.subr.bf16.mxu0 %v1077_v0  ;;  %1063 = vmatprep.subr.bf16.mxu1 %v1077_v0  ;;  %v94_v23 = vsel %vm84_vm0, %v1162_v18, 0.0  ;;  %v96_v26 = vsel %vm84_vm0, %v1169_v21, 0.0  ;;  %v1183_v27 = vld [vmem:[%s2634_s0 + $0x40] sm:$0xff]  ;;  %v98_v29 = vsel %vm84_vm0, %v1176_v24, 0.0  ;;  %v1190_v30 = vld [vmem:[%s2634_s0 + $0x48] sm:$0xff]  ;;  %v1197_v33 = vld [vmem:[%s2634_s0 + $0x50] sm:$0xff]  ;;  %v219_v2 = vmul.f32 %v1132_v8, %v1132_v8 }
   0x6   :  { %v89_v19 = vadd.f32 %v88_v16, %v87_v15  ;;  %v100_v32 = vsel %vm84_vm0, %v1183_v27, 0.0  ;;  %v102_v35 = vsel %vm84_vm0, %v1190_v30, 0.0  ;;  %v1204_v36 = vld [vmem:[%s2634_s0 + $0x58] sm:$0xff]  ;;  %v104_v38 = vsel %vm84_vm0, %v1197_v33, 0.0  ;;  %v1211_v39 = vld [vmem:[%s2634_s0 + $0x60] sm:$0xff]  ;;  %v1218_v42 = vld [vmem:[%s2634_s0 + $0x68] sm:$0xff] }
   0x7   :  { %v106_v41 = vsel %vm84_vm0, %v1204_v36, 0.0  ;;  %v108_v44 = vsel %vm84_vm0, %v1211_v39, 0.0  ;;  %v1225_v45 = vld [vmem:[%s2634_s0 + $0x70] sm:$0xff]  ;;  %v110_v47 = vsel %vm84_vm0, %v1218_v42, 0.0  ;;  %v1232_v48 = vld [vmem:[%s2634_s0 + $0x78] sm:$0xff]  ;;  %v1239_v51 = vld [vmem:[%s2634_s0 + $0x80] sm:$0xff]  ;;  %v220_v3 = vmul.f32 %v1139_v9, %v1139_v9 }
   0x8   :  { %1059 = vmatpush3.bf16.msra.mxu0 %v1058_v13  ;;  %1065 = vmatpush3.bf16.msra.mxu1 %v1058_v13  ;;  %v91_v22 = vadd.f32 %v90_v17, %v89_v19  ;;  %v112_v50 = vsel %vm84_vm0, %v1225_v45, 0.0  ;;  %v114_v53 = vsel %vm84_vm0, %v1232_v48, 0.0  ;;  %v1246_v54 = vld [vmem:[%s2634_s0 + $0x88] sm:$0xff]  ;;  %v116_v56 = vsel %vm84_vm0, %v1239_v51, 0.0  ;;  %v1253_v57 = vld [vmem:[%s2634_s0 + $0x90] sm:$0xff]  ;;  %v1260_v60 = vld [vmem:[%s2634_s0 + $0x98] sm:$0xff] }
   0x9   :  { %1069 = vmatprep.subr.bf16.mxu1 %v1077_v0  ;;  %1066 = vmatprep.subr.bf16.mxu0 %v1077_v0  ;;  %v118_v59 = vsel %vm84_vm0, %v1246_v54, 0.0  ;;  %v120_v62 = vsel %vm84_vm0, %v1253_v57, 0.0  ;;  %v1269_v0 = vld [vmem:[%s2634_s0 + $0xa0] sm:$0xff]  ;;  %v122_v4 = vsel %vm84_vm0, %v1260_v60, 0.0  ;;  %v1280_v5 = vld [vmem:[%s2634_s0 + $0xa8] sm:$0xff]  ;;  %v221_v12 = vmul.f32 %v1144_v10, %v1144_v10  ;;  %v1290_v16 = vld [vmem:[%s2634_s0 + $0xb0] sm:$0xff] }
   0xa   :  { %v93_v25 = vadd.f32 %v92_v20, %v91_v22  ;;  %v124_v13 = vsel %vm84_vm0, %v1269_v0, 0.0  ;;  %v282_v15 = vsel %vm84_vm0, %v218_v63, 0.0  ;;  %v222_v19 = vmul.f32 %v1153_v14, %v1153_v14 }
   0xb   :  { %v283_v20 = vsel %vm84_vm0, %v219_v2, 0.0  ;;  %v285_v22 = vsel %vm84_vm0, %v220_v3, 0.0 }
   0xc   :  { %v95_v28 = vadd.f32 %v94_v23, %v93_v25  ;;  %v126_v23 = vsel %vm84_vm0, %v1280_v5, 0.0  ;;  %v284_v25 = vadd.f32 %v283_v20, %v282_v15  ;;  %v1361_v20 = vld [vmem:[%s2634_s0 + $0xe8] sm:$0xff] }
   0xd   :  { %2665 = vst [vmem:[#allocation4_spill] sm:$0xff] %v1361_v20 }
   0xe   :  { %v97_v31 = vadd.f32 %v96_v26, %v95_v28  ;;  %v1301_v26 = vld [vmem:[%s2634_s0 + $0xb8] sm:$0xff] }
  0x10   :  { %v99_v34 = vadd.f32 %v98_v29, %v97_v31  ;;  %v223_v29 = vmul.f32 %v1162_v18, %v1162_v18  ;;  %v287_v31 = vsel %vm84_vm0, %v221_v12, 0.0 }
  0x12   :  { %v101_v37 = vadd.f32 %v100_v32, %v99_v34  ;;  %v128_v32 = vsel %vm84_vm0, %v1290_v16, 0.0  ;;  %v286_v34 = vadd.f32 %v285_v22, %v284_v25 }
  0x14   :  { %v103_v40 = vadd.f32 %v102_v35, %v101_v37  ;;  %v1311_v35 = vld [vmem:[%s2634_s0 + $0xc0] sm:$0xff] }
  0x16   :  { %v105_v43 = vadd.f32 %v104_v38, %v103_v40  ;;  %v224_v38 = vmul.f32 %v1169_v21, %v1169_v21  ;;  %v289_v40 = vsel %vm84_vm0, %v222_v19, 0.0 }
  0x18   :  { %v107_v46 = vadd.f32 %v106_v41, %v105_v43  ;;  %v130_v41 = vsel %vm84_vm0, %v1301_v26, 0.0  ;;  %v288_v43 = vadd.f32 %v287_v31, %v286_v34  ;;  %v1371_v31 = vld [vmem:[%s2634_s0 + $0xf0] sm:$0xff]  ;;  %v230_v34 = vmul.f32 %v1211_v39, %v1211_v39 }
  0x19   :  { %2666 = vst [vmem:[#allocation5_spill] sm:$0xff] %v1371_v31 }
  0x1a   :  { %v109_v49 = vadd.f32 %v108_v44, %v107_v46  ;;  %v1321_v44 = vld [vmem:[%s2634_s0 + $0xc8] sm:$0xff] }
  0x1c   :  { %v111_v52 = vadd.f32 %v110_v47, %v109_v49  ;;  %v225_v47 = vmul.f32 %v1176_v24, %v1176_v24  ;;  %v291_v49 = vsel %vm84_vm0, %v223_v29, 0.0 }
  0x1e   :  { %v113_v55 = vadd.f32 %v112_v50, %v111_v52  ;;  %v132_v50 = vsel %vm84_vm0, %v1311_v35, 0.0  ;;  %v290_v52 = vadd.f32 %v289_v40, %v288_v43  ;;  %v295_v2 = vsel %vm84_vm0, %v225_v47, 0.0 }
  0x20   :  { %v115_v58 = vadd.f32 %v114_v53, %v113_v55  ;;  %v1331_v53 = vld [vmem:[%s2634_s0 + $0xd0] sm:$0xff] }
  0x21   :  { %v136_v3 = vsel %vm84_vm0, %v1331_v53, 0.0 }
  0x22   :  { %v117_v61 = vadd.f32 %v116_v56, %v115_v58  ;;  %v226_v56 = vmul.f32 %v1183_v27, %v1183_v27  ;;  %v293_v58 = vsel %vm84_vm0, %v224_v38, 0.0  ;;  %v142_v38 = vsel %vm84_vm0, %v1361_v20, 0.0 }
  0x24   :  { %v119_v1 = vadd.f32 %v118_v59, %v117_v61  ;;  %v134_v59 = vsel %vm84_vm0, %v1321_v44, 0.0  ;;  %v292_v61 = vadd.f32 %v291_v49, %v290_v52  ;;  %v297_v15 = vsel %vm84_vm0, %v226_v56, 0.0  ;;  %v1391_v52 = vld [vmem:[%s2634_s0 + $0x100] sm:$0xff] }
  0x25   :  { %v144_v49 = vsel %vm84_vm0, %v1371_v31, 0.0  ;;  %2668 = vst [vmem:[#allocation7_spill] sm:$0xff] %v1391_v52  ;;  %v232_v56 = vmul.f32 %v1225_v45, %v1225_v45 }
  0x26   :  { %v121_v11 = vadd.f32 %v120_v62, %v119_v1  ;;  %v1341_v62 = vld [vmem:[%s2634_s0 + $0xd8] sm:$0xff]  ;;  %v227_v1 = vmul.f32 %v1190_v30, %v1190_v30 }
  0x27   :  { %2663 = vst [vmem:[#allocation2_spill] sm:$0xff] %v1341_v62 }
  0x28   :  { %v123_v17 = vadd.f32 %v122_v4, %v121_v11  ;;  %v294_v4 = vadd.f32 %v293_v58, %v292_v61  ;;  %v1351_v11 = vld [vmem:[%s2634_s0 + $0xe0] sm:$0xff]  ;;  %v299_v25 = vsel %vm84_vm0, %v227_v1, 0.0  ;;  %v305_v58 = vsel %vm84_vm0, %v230_v34, 0.0 }
  0x29   :  { %2664 = vst [vmem:[#allocation3_spill] sm:$0xff] %v1351_v11 }
  0x2a   :  { %v125_v28 = vadd.f32 %v124_v13, %v123_v17  ;;  %v228_v13 = vmul.f32 %v1197_v33, %v1197_v33  ;;  %v138_v17 = vsel %vm84_vm0, %v1341_v62, 0.0  ;;  %v296_v19 = vadd.f32 %v295_v2, %v294_v4 }
  0x2b   :  { %v233_v2 = vmul.f32 %v1232_v48, %v1232_v48  ;;  %v148_v4 = vsel %vm84_vm0, %v1391_v52, 0.0 }
  0x2c   :  { %v127_v37 = vadd.f32 %v126_v23, %v125_v28  ;;  %v229_v23 = vmul.f32 %v1204_v36, %v1204_v36  ;;  %v140_v28 = vsel %vm84_vm0, %v1351_v11, 0.0  ;;  %v298_v29 = vadd.f32 %v297_v15, %v296_v19 }
  0x2d   :  { %v309_v19 = vsel %vm84_vm0, %v232_v56, 0.0  ;;  %v237_v56 = vmul.f32 %v1260_v60, %v1260_v60 }
  0x2e   :  { %v129_v46 = vadd.f32 %v128_v32, %v127_v37  ;;  %v301_v37 = vsel %vm84_vm0, %v228_v13, 0.0  ;;  %v300_v40 = vadd.f32 %v299_v25, %v298_v29  ;;  %v303_v47 = vsel %vm84_vm0, %v229_v23, 0.0  ;;  %v1411_v13 = vld [vmem:[%s2634_s0 + $0x110] sm:$0xff]  ;;  %v1421_v25 = vld [vmem:[%s2634_s0 + $0x118] sm:$0xff] }
  0x2f   :  { %2670 = vst [vmem:[#allocation9_spill] sm:$0xff] %v1411_v13  ;;  %2671 = vst [vmem:[#allocation10_spill] sm:$0xff] %v1421_v25  ;;  %v235_v29 = vmul.f32 %v1246_v54, %v1246_v54  ;;  %v152_v34 = vsel %vm84_vm0, %v1411_v13, 0.0 }
  0x30   :  { %v131_v55 = vadd.f32 %v130_v41, %v129_v46  ;;  %v1381_v41 = vld [vmem:[%s2634_s0 + $0xf8] sm:$0xff]  ;;  %v231_v46 = vmul.f32 %v1218_v42, %v1218_v42 }
  0x31   :  { %2667 = vst [vmem:[#allocation6_spill] sm:$0xff] %v1381_v41 }
  0x32   :  { %v133_v63 = vadd.f32 %v132_v50, %v131_v55  ;;  %v302_v50 = vadd.f32 %v301_v37, %v300_v40 }
  0x34   :  { %v135_v12 = vadd.f32 %v134_v59, %v133_v63  ;;  %v146_v59 = vsel %vm84_vm0, %v1381_v41, 0.0  ;;  %v304_v61 = vadd.f32 %v303_v47, %v302_v50  ;;  %v1401_v63 = vld [vmem:[%s2634_s0 + $0x108] sm:$0xff]  ;;  %v154_v47 = vsel %vm84_vm0, %v1421_v25, 0.0 }
  0x35   :  { %2669 = vst [vmem:[#allocation8_spill] sm:$0xff] %v1401_v63  ;;  %v1441_v50 = vld [vmem:[%s2634_s0 + $0x128] sm:$0xff] }
  0x36   :  { %v137_v22 = vadd.f32 %v136_v3, %v135_v12  ;;  %v307_v3 = vsel %vm84_vm0, %v231_v46, 0.0  ;;  %v306_v12 = vadd.f32 %v305_v58, %v304_v61  ;;  %2673 = vst [vmem:[#allocation12_spill] sm:$0xff] %v1441_v50  ;;  %v315_v58 = vsel %vm84_vm0, %v235_v29, 0.0 }
  0x38   :  { %v139_v32 = vadd.f32 %v138_v17, %v137_v22  ;;  %v234_v17 = vmul.f32 %v1239_v51, %v1239_v51  ;;  %v150_v22 = vsel %vm84_vm0, %v1401_v63, 0.0  ;;  %v308_v23 = vadd.f32 %v307_v3, %v306_v12 }
  0x39   :  { %v238_v3 = vmul.f32 %v1269_v0, %v1269_v0  ;;  %v158_v12 = vsel %vm84_vm0, %v1441_v50, 0.0 }
  0x3a   :  { %v141_v43 = vadd.f32 %v140_v28, %v139_v32  ;;  %v311_v32 = vsel %vm84_vm0, %v233_v2, 0.0  ;;  %v310_v37 = vadd.f32 %v309_v19, %v308_v23  ;;  %v313_v46 = vsel %vm84_vm0, %v234_v17, 0.0  ;;  %v1461_v17 = vld [vmem:[%s2634_s0 + $0x138] sm:$0xff] }
  0x3b   :  { %2675 = vst [vmem:[#allocation14_spill] sm:$0xff] %v1461_v17  ;;  %v319_v23 = vsel %vm84_vm0, %v237_v56, 0.0 }
  0x3c   :  { %v143_v55 = vadd.f32 %v142_v38, %v141_v43  ;;  %v1431_v38 = vld [vmem:[%s2634_s0 + $0x120] sm:$0xff]  ;;  %v236_v43 = vmul.f32 %v1253_v57, %v1253_v57 }
  0x3d   :  { %2672 = vst [vmem:[#allocation11_spill] sm:$0xff] %v1431_v38 }
  0x3e   :  { %v145_v1 = vadd.f32 %v144_v49, %v143_v55  ;;  %v312_v49 = vadd.f32 %v311_v32, %v310_v37  ;;  %v1471_v32 = vld [vmem:[%s2634_s0 + $0x140] sm:$0xff]  ;;  %v240_v37 = vmul.f32 %v1290_v16, %v1290_v16 }
  0x3f   :  { %2676 = vst [vmem:[#allocation15_spill] sm:$0xff] %v1471_v32 }
  0x40   :  { %v147_v15 = vadd.f32 %v146_v59, %v145_v1  ;;  %v156_v59 = vsel %vm84_vm0, %v1431_v38, 0.0  ;;  %v314_v61 = vadd.f32 %v313_v46, %v312_v49  ;;  %v1451_v1 = vld [vmem:[%s2634_s0 + $0x130] sm:$0xff] }
  0x41   :  { %2674 = vst [vmem:[#allocation13_spill] sm:$0xff] %v1451_v1 }
  0x42   :  { %v149_v28 = vadd.f32 %v148_v4, %v147_v15  ;;  %v317_v4 = vsel %vm84_vm0, %v236_v43, 0.0  ;;  %v316_v15 = vadd.f32 %v315_v58, %v314_v61  ;;  %v162_v43 = vsel %vm84_vm0, %v1461_v17, 0.0  ;;  %v1491_v61 = vld [vmem:[%s2634_s0 + $0x150] sm:$0xff] }
  0x43   :  { %v164_v58 = vsel %vm84_vm0, %v1471_v32, 0.0  ;;  %2678 = vst [vmem:[#allocation17_spill] sm:$0xff] %v1491_v61 }
  0x44   :  { %v151_v40 = vadd.f32 %v150_v22, %v149_v28  ;;  %v239_v22 = vmul.f32 %v1280_v5, %v1280_v5  ;;  %v160_v28 = vsel %vm84_vm0, %v1451_v1, 0.0  ;;  %v318_v29 = vadd.f32 %v317_v4, %v316_v15 }
  0x45   :  { %v325_v4 = vsel %vm84_vm0, %v240_v37, 0.0  ;;  %v1511_v37 = vld [vmem:[%s2634_s0 + $0x160] sm:$0xff] }
  0x46   :  { %v153_v55 = vadd.f32 %v152_v34, %v151_v40  ;;  %v321_v40 = vsel %vm84_vm0, %v238_v3, 0.0  ;;  %v320_v46 = vadd.f32 %v319_v23, %v318_v29  ;;  %v323_v56 = vsel %vm84_vm0, %v239_v22, 0.0  ;;  %2680 = vst [vmem:[#allocation19_spill] sm:$0xff] %v1511_v37 }
  0x47   :  { %v242_v3 = vmul.f32 %v1311_v35, %v1311_v35  ;;  %v243_v23 = vmul.f32 %v1321_v44, %v1321_v44  ;;  %v168_v29 = vsel %vm84_vm0, %v1491_v61, 0.0 }
  0x48   :  { %v155_v2 = vadd.f32 %v154_v47, %v153_v55  ;;  %v1481_v47 = vld [vmem:[%s2634_s0 + $0x148] sm:$0xff]  ;;  %v241_v55 = vmul.f32 %v1301_v26, %v1301_v26 }
  0x49   :  { %2677 = vst [vmem:[#allocation16_spill] sm:$0xff] %v1481_v47 }
  0x4a   :  { %v157_v19 = vadd.f32 %v156_v59, %v155_v2  ;;  %v322_v59 = vadd.f32 %v321_v40, %v320_v46  ;;  %v329_v46 = vsel %vm84_vm0, %v242_v3, 0.0  ;;  %v1531_v3 = vld [vmem:[%s2634_s0 + $0x170] sm:$0xff] }
  0x4c   :  { %v159_v34 = vadd.f32 %v158_v12, %v157_v19  ;;  %v166_v12 = vsel %vm84_vm0, %v1481_v47, 0.0  ;;  %v324_v15 = vadd.f32 %v323_v56, %v322_v59  ;;  %v1501_v19 = vld [vmem:[%s2634_s0 + $0x158] sm:$0xff]  ;;  %v245_v59 = vmul.f32 %v1341_v62, %v1341_v62 }
  0x4d   :  { %2679 = vst [vmem:[#allocation18_spill] sm:$0xff] %v1501_v19 }
  0x4e   :  { %v161_v49 = vadd.f32 %v160_v28, %v159_v34  ;;  %v327_v28 = vsel %vm84_vm0, %v241_v55, 0.0  ;;  %v326_v34 = vadd.f32 %v325_v4, %v324_v15  ;;  %v1521_v55 = vld [vmem:[%s2634_s0 + $0x168] sm:$0xff]  ;;  %v172_v4 = vsel %vm84_vm0, %v1511_v37, 0.0 }
  0x4f   :  { %2681 = vst [vmem:[#allocation20_spill] sm:$0xff] %v1521_v55 }
  0x50   :  { %v163_v2 = vadd.f32 %v162_v43, %v161_v49  ;;  %v244_v43 = vmul.f32 %v1331_v53, %v1331_v53  ;;  %v170_v49 = vsel %vm84_vm0, %v1501_v19, 0.0  ;;  %v328_v56 = vadd.f32 %v327_v28, %v326_v34 }
  0x52   :  { %v165_v22 = vadd.f32 %v164_v58, %v163_v2  ;;  %v331_v2 = vsel %vm84_vm0, %v243_v23, 0.0  ;;  %v333_v28 = vsel %vm84_vm0, %v244_v43, 0.0  ;;  %v1541_v23 = vld [vmem:[%s2634_s0 + $0x178] sm:$0xff]  ;;  %v1551_v43 = vld [vmem:[%s2634_s0 + $0x180] sm:$0xff] }
  0x54   :  { %v167_v40 = vadd.f32 %v166_v12, %v165_v22  ;;  %v330_v12 = vadd.f32 %v329_v46, %v328_v56  ;;  %v246_v22 = vmul.f32 %v1351_v11, %v1351_v11  ;;  %v247_v46 = vmul.f32 %v1361_v20, %v1361_v20 }
  0x55   :  { %v176_v56 = vsel %vm84_vm0, %v1531_v3, 0.0  ;;  %v264_v20 = vmul.f32 %v1531_v3, %v1531_v3 }
  0x56   :  { %v169_v58 = vadd.f32 %v168_v29, %v167_v40  ;;  %v174_v29 = vsel %vm84_vm0, %v1521_v55, 0.0  ;;  %v332_v34 = vadd.f32 %v331_v2, %v330_v12  ;;  %v248_v12 = vmul.f32 %v1371_v31, %v1371_v31 }
  0x58   :  { %v171_v15 = vadd.f32 %v170_v49, %v169_v58  ;;  %v335_v49 = vsel %vm84_vm0, %v245_v59, 0.0  ;;  %v334_v58 = vadd.f32 %v333_v28, %v332_v34  ;;  %v1561_v59 = vld [vmem:[%s2634_s0 + $0x188] sm:$0xff]  ;;  %v249_v34 = vmul.f32 %v1381_v41, %v1381_v41 }
  0x5a   :  { %v173_v40 = vadd.f32 %v172_v4, %v171_v15  ;;  %v337_v4 = vsel %vm84_vm0, %v246_v22, 0.0  ;;  %v178_v15 = vsel %vm84_vm0, %v1541_v23, 0.0  ;;  %v336_v6 = vadd.f32 %v335_v49, %v334_v58  ;;  %v1571_v22 = vld [vmem:[%s2634_s0 + $0x190] sm:$0xff] }
  0x5b   :  { %v250_v58 = vmul.f32 %v1391_v52, %v1391_v52 }
  0x5c   :  { %v175_v2 = vadd.f32 %v174_v29, %v173_v40  ;;  %v339_v29 = vsel %vm84_vm0, %v247_v46, 0.0  ;;  %v180_v40 = vsel %vm84_vm0, %v1551_v43, 0.0  ;;  %v338_v31 = vadd.f32 %v337_v4, %v336_v6  ;;  %v1581_v46 = vld [vmem:[%s2634_s0 + $0x198] sm:$0xff] }
  0x5d   :  { %v251_v4 = vmul.f32 %v1401_v63, %v1401_v63 }
  0x5e   :  { %v177_v28 = vadd.f32 %v176_v56, %v175_v2  ;;  %v341_v56 = vsel %vm84_vm0, %v248_v12, 0.0  ;;  %v182_v2 = vsel %vm84_vm0, %v1561_v59, 0.0  ;;  %v340_v41 = vadd.f32 %v339_v29, %v338_v31  ;;  %v1591_v12 = vld [vmem:[%s2634_s0 + $0x1a0] sm:$0xff] }
  0x5f   :  { %v252_v29 = vmul.f32 %v1411_v13, %v1411_v13 }
  0x60   :  { %v179_v49 = vadd.f32 %v178_v15, %v177_v28  ;;  %v343_v15 = vsel %vm84_vm0, %v249_v34, 0.0  ;;  %v184_v28 = vsel %vm84_vm0, %v1571_v22, 0.0  ;;  %v342_v52 = vadd.f32 %v341_v56, %v340_v41  ;;  %v1601_v34 = vld [vmem:[%s2634_s0 + $0x1a8] sm:$0xff] }
  0x61   :  { %v253_v56 = vmul.f32 %v1421_v25, %v1421_v25 }
  0x62   :  { %v181_v6 = vadd.f32 %v180_v40, %v179_v49  ;;  %v345_v40 = vsel %vm84_vm0, %v250_v58, 0.0  ;;  %v186_v49 = vsel %vm84_vm0, %v1581_v46, 0.0  ;;  %v344_v63 = vadd.f32 %v343_v15, %v342_v52  ;;  %v1611_v58 = vld [vmem:[%s2634_s0 + $0x1b0] sm:$0xff] }
  0x63   :  { %v254_v15 = vmul.f32 %v1431_v38, %v1431_v38 }
  0x64   :  { %v183_v31 = vadd.f32 %v182_v2, %v181_v6  ;;  %v347_v2 = vsel %vm84_vm0, %v251_v4, 0.0  ;;  %v188_v6 = vsel %vm84_vm0, %v1591_v12, 0.0  ;;  %v346_v13 = vadd.f32 %v345_v40, %v344_v63  ;;  %v1621_v4 = vld [vmem:[%s2634_s0 + $0x1b8] sm:$0xff] }
  0x65   :  { %v255_v40 = vmul.f32 %v1441_v50, %v1441_v50 }
  0x66   :  { %v185_v41 = vadd.f32 %v184_v28, %v183_v31  ;;  %v349_v28 = vsel %vm84_vm0, %v252_v29, 0.0  ;;  %v190_v31 = vsel %vm84_vm0, %v1601_v34, 0.0  ;;  %v348_v25 = vadd.f32 %v347_v2, %v346_v13  ;;  %v1631_v29 = vld [vmem:[%s2634_s0 + $0x1c0] sm:$0xff] }
  0x67   :  { %v256_v2 = vmul.f32 %v1451_v1, %v1451_v1 }
  0x68   :  { %v187_v52 = vadd.f32 %v186_v49, %v185_v41  ;;  %v351_v49 = vsel %vm84_vm0, %v253_v56, 0.0  ;;  %v192_v41 = vsel %vm84_vm0, %v1611_v58, 0.0  ;;  %v350_v38 = vadd.f32 %v349_v28, %v348_v25  ;;  %v1641_v56 = vld [vmem:[%s2634_s0 + $0x1c8] sm:$0xff] }
  0x69   :  { %v257_v28 = vmul.f32 %v1461_v17, %v1461_v17 }
  0x6a   :  { %v189_v63 = vadd.f32 %v188_v6, %v187_v52  ;;  %v353_v6 = vsel %vm84_vm0, %v254_v15, 0.0  ;;  %v194_v52 = vsel %vm84_vm0, %v1621_v4, 0.0  ;;  %v352_v50 = vadd.f32 %v351_v49, %v350_v38  ;;  %v1651_v15 = vld [vmem:[%s2634_s0 + $0x1d0] sm:$0xff] }
  0x6b   :  { %v258_v49 = vmul.f32 %v1471_v32, %v1471_v32 }
  0x6c   :  { %v191_v13 = vadd.f32 %v190_v31, %v189_v63  ;;  %v355_v31 = vsel %vm84_vm0, %v255_v40, 0.0  ;;  %v196_v63 = vsel %vm84_vm0, %v1631_v29, 0.0  ;;  %v354_v1 = vadd.f32 %v353_v6, %v352_v50  ;;  %v1661_v40 = vld [vmem:[%s2634_s0 + $0x1d8] sm:$0xff] }
  0x6d   :  { %v259_v6 = vmul.f32 %v1481_v47, %v1481_v47 }
  0x6e   :  { %v193_v25 = vadd.f32 %v192_v41, %v191_v13  ;;  %v357_v41 = vsel %vm84_vm0, %v256_v2, 0.0  ;;  %v198_v13 = vsel %vm84_vm0, %v1641_v56, 0.0  ;;  %v356_v17 = vadd.f32 %v355_v31, %v354_v1  ;;  %v1671_v2 = vld [vmem:[%s2634_s0 + $0x1e0] sm:$0xff] }
  0x6f   :  { %v260_v31 = vmul.f32 %v1491_v61, %v1491_v61 }
  0x70   :  { %v195_v38 = vadd.f32 %v194_v52, %v193_v25  ;;  %v359_v52 = vsel %vm84_vm0, %v257_v28, 0.0  ;;  %v200_v25 = vsel %vm84_vm0, %v1651_v15, 0.0  ;;  %v358_v32 = vadd.f32 %v357_v41, %v356_v17  ;;  %v1681_v28 = vld [vmem:[%s2634_s0 + $0x1e8] sm:$0xff] }
  0x71   :  { %2682 = vst [vmem:[#allocation21_spill] sm:$0xff] %v1681_v28  ;;  %v261_v41 = vmul.f32 %v1501_v19, %v1501_v19 }
  0x72   :  { %v197_v50 = vadd.f32 %v196_v63, %v195_v38  ;;  %v361_v63 = vsel %vm84_vm0, %v258_v49, 0.0  ;;  %v202_v38 = vsel %vm84_vm0, %v1661_v40, 0.0  ;;  %v360_v47 = vadd.f32 %v359_v52, %v358_v32  ;;  %v1691_v49 = vld [vmem:[%s2634_s0 + $0x1f0] sm:$0xff] }
  0x73   :  { %2683 = vst [vmem:[#allocation22_spill] sm:$0xff] %v1691_v49  ;;  %v262_v52 = vmul.f32 %v1511_v37, %v1511_v37 }
  0x74   :  { %v199_v1 = vadd.f32 %v198_v13, %v197_v50  ;;  %v363_v13 = vsel %vm84_vm0, %v259_v6, 0.0  ;;  %v204_v50 = vsel %vm84_vm0, %v1671_v2, 0.0  ;;  %v362_v61 = vadd.f32 %v361_v63, %v360_v47  ;;  %v1701_v6 = vld [vmem:[%s2634_s0 + $0x1f8] sm:$0xff] }
  0x75   :  { %v263_v63 = vmul.f32 %v1521_v55, %v1521_v55 }
  0x76   :  { %v201_v17 = vadd.f32 %v200_v25, %v199_v1  ;;  %v365_v25 = vsel %vm84_vm0, %v260_v31, 0.0  ;;  %v206_v1 = vsel %vm84_vm0, %v1681_v28, 0.0  ;;  %v364_v19 = vadd.f32 %v363_v13, %v362_v61 }
  0x77   :  { %v369_v61 = vsel %vm84_vm0, %v262_v52, 0.0  ;;  %v210_v13 = vsel %vm84_vm0, %v1701_v6, 0.0  ;;  %v267_v52 = vmul.f32 %v1561_v59, %v1561_v59 }
  0x78   :  { %v203_v32 = vadd.f32 %v202_v38, %v201_v17  ;;  %v367_v38 = vsel %vm84_vm0, %v261_v41, 0.0  ;;  %v208_v17 = vsel %vm84_vm0, %v1691_v49, 0.0  ;;  %v366_v37 = vadd.f32 %v365_v25, %v364_v19 }
  0x79   :  { %v371_v41 = vsel %vm84_vm0, %v263_v63, 0.0  ;;  %v266_v19 = vmul.f32 %v1551_v43, %v1551_v43  ;;  %v373_v25 = vsel %vm84_vm0, %v264_v20, 0.0  ;;  %v379_v20 = vsel %vm84_vm0, %v267_v52, 0.0 }
  0x7a   :  { %v205_v47 = vadd.f32 %v204_v50, %v203_v32  ;;  %v368_v11 = vadd.f32 %v367_v38, %v366_v37  ;;  %v265_v32 = vmul.f32 %v1541_v23, %v1541_v23 }
  0x7c   :  { %v207_v31 = vadd.f32 %v206_v1, %v205_v47  ;;  %v370_v55 = vadd.f32 %v369_v61, %v368_v11  ;;  %v375_v37 = vsel %vm84_vm0, %v265_v32, 0.0  ;;  %v377_v11 = vsel %vm84_vm0, %v266_v19, 0.0 }
  0x7e   :  { %v209_v50 = vadd.f32 %v208_v17, %v207_v31  ;;  %v372_v1 = vadd.f32 %v371_v41, %v370_v55  ;;  %v268_v31 = vmul.f32 %v1571_v22, %v1571_v22  ;;  %v270_v41 = vmul.f32 %v1591_v12, %v1591_v12 }
  0x80   :  { %v211_v62 = vadd.f32 %v210_v13, %v209_v50  ;;  %v374_v38 = vadd.f32 %v373_v25, %v372_v1  ;;  %v269_v13 = vmul.f32 %v1581_v46, %v1581_v46  ;;  %v381_v32 = vsel %vm84_vm0, %v268_v31, 0.0 }
  0x81   :  { %v271_v1 = vmul.f32 %v1601_v34, %v1601_v34  ;;  %v385_v52 = vsel %vm84_vm0, %v270_v41, 0.0  ;;  %v273_v31 = vmul.f32 %v1621_v4, %v1621_v4 }
  0x82   :  { %v212_v47 = vrot.slane %v211_v62, 4  ;;  %v376_v63 = vadd.f32 %v375_v37, %v374_v38  ;;  %v383_v19 = vsel %vm84_vm0, %v269_v13, 0.0  ;;  %v272_v38 = vmul.f32 %v1611_v58, %v1611_v58 }
  0x83   :  { %v274_v13 = vmul.f32 %v1631_v29, %v1631_v29  ;;  %v391_v41 = vsel %vm84_vm0, %v273_v31, 0.0  ;;  %v279_v31 = vmul.f32 %v1681_v28, %v1681_v28 }
  0x84   :  { %v213_v17 = vadd.f32 %v212_v47, %v211_v62  ;;  %v378_v55 = vadd.f32 %v377_v11, %v376_v63  ;;  %v387_v11 = vsel %vm84_vm0, %v271_v1, 0.0 }
  0x86   :  { %v214_v61 = vrot.slane %v213_v17, 2  ;;  %v380_v62 = vadd.f32 %v379_v20, %v378_v55  ;;  %v389_v20 = vsel %vm84_vm0, %v272_v38, 0.0  ;;  %v278_v38 = vmul.f32 %v1671_v2, %v1671_v2 }
  0x88   :  { %v215_v50 = vadd.f32 %v214_v61, %v213_v17  ;;  %v382_v47 = vadd.f32 %v381_v32, %v380_v62  ;;  %v2684_v61 = vmov 0.0   ;;  %v276_v62 = vmul.f32 %v1651_v15, %v1651_v15 }
  0x8a   :  { %v216_v25 = vrot.slane %v215_v50, 1  ;;  %v384_v17 = vadd.f32 %v383_v19, %v382_v47  ;;  %v277_v19 = vmul.f32 %v1661_v40, %v1661_v40 }
  0x8c   :  { %v217_v37 = vadd.f32 %v216_v25, %v215_v50  ;;  %v386_v63 = vadd.f32 %v385_v52, %v384_v17  ;;  %v275_v50 = vmul.f32 %v1641_v56, %v1641_v56  ;;  %v393_v25 = vsel %vm84_vm0, %v274_v13, 0.0 }
  0x8d   :  { %v397_v52 = vsel %vm84_vm0, %v276_v62, 0.0  ;;  %v280_v13 = vmul.f32 %v1691_v49, %v1691_v49 }
  0x8e   :  { %1027 = vmatmul.mubr.msk.f32.vlgmr.msra.gmra.mrb[0].mxu0 %vm84_vm0, %v217_v37  ;;  %v388_v55 = vadd.f32 %v387_v11, %v386_v63  ;;  %v395_v47 = vsel %vm84_vm0, %v275_v50, 0.0  ;;  %v399_v11 = vsel %vm84_vm0, %v277_v19, 0.0  ;;  %v281_v50 = vmul.f32 %v1701_v6, %v1701_v6 }
  0x8f   :  { %1044 = vmatprep.mubr.msk.f32.mxu0 %vm1078_vm1, %v2684_v61  ;;  %v405_v62 = vsel %vm84_vm0, %v280_v13, 0.0 }
  0x90   :  { %v390_v32 = vadd.f32 %v389_v20, %v388_v55  ;;  %v401_v20 = vsel %vm84_vm0, %v278_v38, 0.0 }
  0x92   :  { %v392_v1 = vadd.f32 %v391_v41, %v390_v32  ;;  %v403_v41 = vsel %vm84_vm0, %v279_v31, 0.0  ;;  %v419_v31 = vld [vmem:[%s2635_s4] sm:$0xff] }
  0x94   :  { %v394_v37 = vadd.f32 %v393_v25, %v392_v1  ;;  %v407_v1 = vsel %vm84_vm0, %v281_v50, 0.0 }
  0x96   :  { %v396_v17 = vadd.f32 %v395_v47, %v394_v37 }
  0x98   :  { %v398_v63 = vadd.f32 %v397_v52, %v396_v17 }
  0x9a   :  { %v400_v55 = vadd.f32 %v399_v11, %v398_v63  ;;  %v420_v11 = vld [vmem:[%s2635_s4 + $0x8] sm:$0xff] }
  0x9b   :  { %v1067_v63 = vpack.c.bf16 %v420_v11, %v419_v31  ;;  %v1787_v11 = vld [vmem:[%s2637_s2] sm:$0x1] }
  0x9c   :  { %v402_v32 = vadd.f32 %v401_v20, %v400_v55 }
  0x9d   :  { %1068 = vmatpush3.bf16.msra.mxu0 %v1067_v63 }
  0x9e   :  { %v404_v25 = vadd.f32 %v403_v41, %v402_v32 }
  0xa0   :  { %v406_v47 = vadd.f32 %v405_v62, %v404_v25 }
  0xa2   :  { %v408_v19 = vadd.f32 %v407_v1, %v406_v47  ;;  %v727_v47 = vlaneseq }
  0xa4   :  { %v409_v37 = vrot.slane %v408_v19, 4 }
  0xa6   :  { %v410_v52 = vadd.f32 %v409_v37, %v408_v19  ;;  %v1778_v19 = vshrl.u32 %v727_v47, 7  ;;  %v721_v37 = vld [vmem:[%s2636_s1] sm:$0x1]  ;;  %v2690_v47 = vld [vmem:[#allocation7_spill] sm:$0xff] }
  0xa8   :  { %v411_v17 = vrot.slane %v410_v52, 2 }
  0xaa   :  { %v412_v49 = vadd.f32 %v411_v17, %v410_v52  ;;  %v2662_v52 = vsub.s32 0, %v1778_v19 }
  0xac   :  { %v413_v28 = vrot.slane %v412_v49, 1 }
  0xae   :  { %v414_v38 = vadd.f32 %v413_v28, %v412_v49 }
  0xb0   :  { %1038 = vmatmul.mubr.msk.f32.vlgmr.msra.gmra.mrb[0].mxu1 %vm84_vm0, %v414_v38 }
  0xb1   :  { %1051 = vmatprep.mubr.msk.f32.mxu1 %vm1078_vm1, %v2684_v61  ;;  %1071 = vmatpush3.bf16.msra.mxu1 %v1067_v63 }
 0x161   :  { %v490_v13 = vpop.f32.mrb[0].mxu0 }
 0x162   :  { %v495_v20 = vmul.f32 0.0009765625, %v490_v13  ;;  %v1028_v28 = vpop.f32.mrb[1].mxu0 }
 0x164   :  { %1052 = vmatmul.mubr.msk.f32.vlgmr.msra.gmra.mrb[2].mxu1 %vm574_vm2, %v495_v20  ;;  %v570_v49 = vmul.f32 %v495_v20, %v495_v20 }
 0x183   :  { %v565_v55 = vpop.f32.mrb[0].mxu1 }
 0x184   :  { %v569_v50 = vmul.f32 0.0009765625, %v565_v55  ;;  %v1039_v61 = vpop.f32.mrb[1].mxu1 }
 0x186   :  { %v571_v41 = vsub.f32 %v569_v50, %v570_v49 }
 0x188   :  { %v572_v32 = vadd.f32 1e-05, %v571_v41  ;;  %v2685_v41 = vld [vmem:[#allocation2_spill] sm:$0xff] }
 0x18a   :  { %1075 = vrsqrt.f32 %v572_v32  ;;  %v2686_v32 = vld [vmem:[#allocation3_spill] sm:$0xff] }
 0x194   :  { %v1076_v62 = vpop.eup %1075 }
 0x195   :  { %1045 = vmatmul.mubr.msk.f32.vlgmr.msra.gmra.mrb[2].mxu0 %vm574_vm2, %v1076_v62  ;;  %v2687_v62 = vld [vmem:[#allocation4_spill] sm:$0xff] }
 0x237   :  { %v717_v25 = vpop.f32.mrb[2].mxu1 }
 0x238   :  { %v1053_v1 = vpop.f32.mrb[3].mxu1 }
 0x239   :  { %v2689_v1 = vld [vmem:[#allocation6_spill] sm:$0xff] }
 0x268   :  { %v644_v17 = vpop.f32.mrb[2].mxu0 }
 0x269   :  { %v722_v38 = vmul.f32 %v721_v37, %v644_v17  ;;  %v1046_v31 = vpop.f32.mrb[3].mxu0  ;;  %v2691_v17 = vld [vmem:[#allocation8_spill] sm:$0xff] }
 0x26a   :  { %v2692_v31 = vld [vmem:[#allocation9_spill] sm:$0xff] }
 0x26b   :  { %v1789_v63 = vmul.f32 %v722_v38, %v717_v25  ;;  %v1793_v13 = vrot.slane %v722_v38, %v2662_v52  ;;  %v2688_v25 = vld [vmem:[#allocation5_spill] sm:$0xff]  ;;  %v2702_v52 = vld [vmem:[#allocation14_spill] sm:$0xff] }
 0x26d   :  { %v725_v20 = vsub.f32 %v1787_v11, %v1789_v63  ;;  %v1799_v28 = vmul.f32 %v1793_v13, %v1127_v7  ;;  %v1803_v49 = vmul.f32 %v1793_v13, %v1132_v8  ;;  %v1807_v55 = vmul.f32 %v1793_v13, %v1139_v9  ;;  %v2694_v63 = vld [vmem:[#allocation10_spill] sm:$0xff] }
 0x26e   :  { %v1811_v50 = vmul.f32 %v1793_v13, %v1144_v10  ;;  %v1815_v61 = vmul.f32 %v1793_v13, %v1153_v14  ;;  %v1819_v7 = vmul.f32 %v1793_v13, %v1162_v18  ;;  %v1823_v8 = vmul.f32 %v1793_v13, %v1169_v21 }
 0x26f   :  { %v1827_v9 = vmul.f32 %v1793_v13, %v1176_v24  ;;  %v1831_v10 = vmul.f32 %v1793_v13, %v1183_v27  ;;  %v1835_v14 = vmul.f32 %v1793_v13, %v1190_v30  ;;  %v1839_v18 = vmul.f32 %v1793_v13, %v1197_v33 }
 0x270   :  { %v1843_v21 = vmul.f32 %v1793_v13, %v1204_v36  ;;  %v1847_v24 = vmul.f32 %v1793_v13, %v1211_v39  ;;  %v1851_v27 = vmul.f32 %v1793_v13, %v1218_v42  ;;  %v1855_v30 = vmul.f32 %v1793_v13, %v1225_v45 }
 0x271   :  { %v1859_v33 = vmul.f32 %v1793_v13, %v1232_v48  ;;  %v1863_v36 = vmul.f32 %v1793_v13, %v1239_v51  ;;  %v1867_v39 = vmul.f32 %v1793_v13, %v1246_v54  ;;  %v1871_v42 = vmul.f32 %v1793_v13, %v1253_v57 }
 0x272   :  { %v1875_v45 = vmul.f32 %v1793_v13, %v1260_v60  ;;  %v1879_v48 = vmul.f32 %v1793_v13, %v1269_v0  ;;  %v1883_v51 = vmul.f32 %v1793_v13, %v1280_v5  ;;  %v1887_v54 = vmul.f32 %v1793_v13, %v1290_v16 }
 0x273   :  { %v1891_v57 = vmul.f32 %v1793_v13, %v1301_v26  ;;  %v1895_v60 = vmul.f32 %v1793_v13, %v1311_v35  ;;  %v1899_v0 = vmul.f32 %v1793_v13, %v1321_v44  ;;  %v1903_v5 = vmul.f32 %v1793_v13, %v1331_v53 }
 0x274   :  { %v1907_v16 = vmul.f32 %v1793_v13, %v2685_v41  ;;  %v1911_v26 = vmul.f32 %v1793_v13, %v2686_v32  ;;  %v1915_v35 = vmul.f32 %v1793_v13, %v2687_v62  ;;  %v1919_v44 = vmul.f32 %v1793_v13, %v2688_v25  ;;  %v2696_v32 = vld [vmem:[#allocation11_spill] sm:$0xff]  ;;  %v2698_v25 = vld [vmem:[#allocation12_spill] sm:$0xff] }
 0x275   :  { %v1923_v53 = vmul.f32 %v1793_v13, %v2689_v1  ;;  %v1927_v37 = vmul.f32 %v1793_v13, %v2690_v47  ;;  %v1931_v38 = vmul.f32 %v1793_v13, %v2691_v17  ;;  %v1935_v11 = vmul.f32 %v1793_v13, %v2692_v31  ;;  %v2700_v47 = vld [vmem:[#allocation13_spill] sm:$0xff] }
 0x276   :  { %v1939_v41 = vmul.f32 %v1793_v13, %v2694_v63  ;;  %v1943_v62 = vmul.f32 %v1793_v13, %v2696_v32  ;;  %v1947_v1 = vmul.f32 %v1793_v13, %v2698_v25  ;;  %v1951_v17 = vmul.f32 %v1793_v13, %v2700_v47 }
 0x277   :  { %2693 = vst [vmem:[#allocation2_spill] sm:$0xff] %v1935_v11  ;;  %v1955_v31 = vmul.f32 %v1793_v13, %v2702_v52  ;;  %v2704_v11 = vld [vmem:[#allocation15_spill] sm:$0xff] }
 0x278   :  { %2695 = vst [vmem:[#allocation3_spill] sm:$0xff] %v1939_v41  ;;  %2697 = vst [vmem:[#allocation4_spill] sm:$0xff] %v1943_v62  ;;  %v1959_v63 = vmul.f32 %v1793_v13, %v2704_v11  ;;  %v2705_v41 = vld [vmem:[#allocation16_spill] sm:$0xff]  ;;  %v2706_v62 = vld [vmem:[#allocation17_spill] sm:$0xff] }
 0x279   :  { %2699 = vst [vmem:[#allocation5_spill] sm:$0xff] %v1947_v1  ;;  %2701 = vst [vmem:[#allocation6_spill] sm:$0xff] %v1951_v17  ;;  %v1963_v32 = vmul.f32 %v1793_v13, %v2705_v41  ;;  %v1967_v25 = vmul.f32 %v1793_v13, %v2706_v62  ;;  %v2707_v1 = vld [vmem:[#allocation18_spill] sm:$0xff]  ;;  %v2708_v17 = vld [vmem:[#allocation19_spill] sm:$0xff]  ;;  %v1983_v41 = vmul.f32 %v1793_v13, %v1531_v3 }
 0x27a   :  { %2703 = vst [vmem:[#allocation7_spill] sm:$0xff] %v1955_v31  ;;  %v1971_v47 = vmul.f32 %v1793_v13, %v2707_v1  ;;  %v1975_v52 = vmul.f32 %v1793_v13, %v2708_v17  ;;  %v2709_v31 = vld [vmem:[#allocation20_spill] sm:$0xff]  ;;  %v1987_v62 = vmul.f32 %v1793_v13, %v1541_v23  ;;  %v1991_v1 = vmul.f32 %v1793_v13, %v1551_v43 }
 0x27b   :  { %v1979_v11 = vmul.f32 %v1793_v13, %v2709_v31  ;;  %v1995_v17 = vmul.f32 %v1793_v13, %v1561_v59  ;;  %v1999_v31 = vmul.f32 %v1793_v13, %v1571_v22  ;;  %v2003_v3 = vmul.f32 %v1793_v13, %v1581_v46 }
 0x27c   :  { %v2007_v23 = vmul.f32 %v1793_v13, %v1591_v12  ;;  %v2011_v43 = vmul.f32 %v1793_v13, %v1601_v34  ;;  %v2015_v59 = vmul.f32 %v1793_v13, %v1611_v58  ;;  %v2019_v22 = vmul.f32 %v1793_v13, %v1621_v4 }
 0x27d   :  { %v2023_v46 = vmul.f32 %v1793_v13, %v1631_v29  ;;  %v2027_v12 = vmul.f32 %v1793_v13, %v1641_v56  ;;  %v2031_v34 = vmul.f32 %v1793_v13, %v1651_v15  ;;  %v2035_v58 = vmul.f32 %v1793_v13, %v1661_v40 }
 0x27e   :  { %2710 = vst [vmem:[#allocation8_spill] sm:$0xff] %v2015_v59  ;;  %v2713_v59 = vsub.s32 0, %v1778_v19  ;;  %v2043_v29 = vmul.f32 %v1793_v13, %v1671_v2  ;;  %v2055_v40 = vmul.f32 %v1793_v13, %v1701_v6 }
 0x27f   :  { %2711 = vst [vmem:[#allocation9_spill] sm:$0xff] %v2023_v46  ;;  %2712 = vst [vmem:[#allocation10_spill] sm:$0xff] %v2027_v12  ;;  %v2714_v46 = vld [vmem:[#allocation21_spill] sm:$0xff]  ;;  %v2715_v12 = vld [vmem:[#allocation22_spill] sm:$0xff] }
 0x280   :  { %v2039_v4 = vrot.slane %v725_v20, %v2713_v59  ;;  %v2047_v56 = vmul.f32 %v1793_v13, %v2714_v46  ;;  %v2051_v15 = vmul.f32 %v1793_v13, %v2715_v12  ;;  %v2720_v46 = vld [vmem:[#allocation3_spill] sm:$0xff]  ;;  %v2721_v12 = vld [vmem:[#allocation4_spill] sm:$0xff] }
 0x282   :  { %v2059_v19 = vadd.f32 %v2039_v4, %v1799_v28  ;;  %v2063_v2 = vadd.f32 %v2039_v4, %v1803_v49  ;;  %v2067_v20 = vadd.f32 %v2039_v4, %v1807_v55  ;;  %v2071_v59 = vadd.f32 %v2039_v4, %v1811_v50 }
 0x283   :  { %v2075_v6 = vadd.f32 %v2039_v4, %v1815_v61  ;;  %v2079_v13 = vadd.f32 %v2039_v4, %v1819_v7  ;;  %v2083_v28 = vadd.f32 %v2039_v4, %v1823_v8  ;;  %v2087_v49 = vadd.f32 %v2039_v4, %v1827_v9 }
 0x284   :  { %v2091_v55 = vadd.f32 %v2039_v4, %v1831_v10  ;;  %v2095_v50 = vadd.f32 %v2039_v4, %v1835_v14  ;;  %v2099_v61 = vadd.f32 %v2039_v4, %v1839_v18  ;;  %v2103_v7 = vadd.f32 %v2039_v4, %v1843_v21 }
 0x285   :  { %v2107_v8 = vadd.f32 %v2039_v4, %v1847_v24  ;;  %v2111_v9 = vadd.f32 %v2039_v4, %v1851_v27  ;;  %v2115_v10 = vadd.f32 %v2039_v4, %v1855_v30  ;;  %v2119_v14 = vadd.f32 %v2039_v4, %v1859_v33 }
 0x286   :  { %v2123_v18 = vadd.f32 %v2039_v4, %v1863_v36  ;;  %v2127_v21 = vadd.f32 %v2039_v4, %v1867_v39  ;;  %v2131_v24 = vadd.f32 %v2039_v4, %v1871_v42  ;;  %v2135_v27 = vadd.f32 %v2039_v4, %v1875_v45 }
 0x287   :  { %v2139_v30 = vadd.f32 %v2039_v4, %v1879_v48  ;;  %v2143_v33 = vadd.f32 %v2039_v4, %v1883_v51  ;;  %v2147_v36 = vadd.f32 %v2039_v4, %v1887_v54  ;;  %v2151_v39 = vadd.f32 %v2039_v4, %v1891_v57 }
 0x288   :  { %v2155_v42 = vadd.f32 %v2039_v4, %v1895_v60  ;;  %v2159_v45 = vadd.f32 %v2039_v4, %v1899_v0  ;;  %v2163_v48 = vadd.f32 %v2039_v4, %v1903_v5  ;;  %v2167_v51 = vadd.f32 %v2039_v4, %v1907_v16 }
 0x289   :  { %v2171_v54 = vadd.f32 %v2039_v4, %v1911_v26  ;;  %v2175_v57 = vadd.f32 %v2039_v4, %v1915_v35  ;;  %v2179_v60 = vadd.f32 %v2039_v4, %v1919_v44  ;;  %v2183_v0 = vadd.f32 %v2039_v4, %v1923_v53  ;;  %v2719_v26 = vld [vmem:[#allocation2_spill] sm:$0xff] }
 0x28a   :  { %v2187_v5 = vadd.f32 %v2039_v4, %v1927_v37  ;;  %v2191_v16 = vadd.f32 %v2039_v4, %v1931_v38  ;;  %v2195_v35 = vadd.f32 %v2039_v4, %v2719_v26  ;;  %v2199_v44 = vadd.f32 %v2039_v4, %v2720_v46 }
 0x28b   :  { %2716 = vst [vmem:[#allocation11_spill] sm:$0xff] %v2183_v0  ;;  %v2203_v53 = vadd.f32 %v2039_v4, %v2721_v12  ;;  %v2722_v0 = vld [vmem:[#allocation5_spill] sm:$0xff]  ;;  %v2219_v46 = vadd.f32 %v2039_v4, %v1959_v63  ;;  %v2223_v12 = vadd.f32 %v2039_v4, %v1963_v32  ;;  %v2239_v63 = vadd.f32 %v2039_v4, %v1979_v11 }
 0x28c   :  { %2717 = vst [vmem:[#allocation12_spill] sm:$0xff] %v2187_v5  ;;  %2718 = vst [vmem:[#allocation13_spill] sm:$0xff] %v2191_v16  ;;  %v2207_v37 = vadd.f32 %v2039_v4, %v2722_v0  ;;  %v2723_v5 = vld [vmem:[#allocation6_spill] sm:$0xff]  ;;  %v2724_v16 = vld [vmem:[#allocation7_spill] sm:$0xff]  ;;  %v2227_v0 = vadd.f32 %v2039_v4, %v1967_v25  ;;  %v2243_v32 = vadd.f32 %v2039_v4, %v1983_v41 }
 0x28d   :  { %v2211_v38 = vadd.f32 %v2039_v4, %v2723_v5  ;;  %v2215_v26 = vadd.f32 %v2039_v4, %v2724_v16  ;;  %v2231_v5 = vadd.f32 %v2039_v4, %v1971_v47  ;;  %v2235_v16 = vadd.f32 %v2039_v4, %v1975_v52 }
 0x28e   :  { %v2247_v25 = vadd.f32 %v2039_v4, %v1987_v62  ;;  %v2251_v47 = vadd.f32 %v2039_v4, %v1991_v1  ;;  %v2255_v52 = vadd.f32 %v2039_v4, %v1995_v17  ;;  %v2259_v11 = vadd.f32 %v2039_v4, %v1999_v31 }
 0x28f   :  { %v2263_v41 = vadd.f32 %v2039_v4, %v2003_v3  ;;  %v2267_v62 = vadd.f32 %v2039_v4, %v2007_v23  ;;  %v2271_v1 = vadd.f32 %v2039_v4, %v2011_v43  ;;  %v2279_v31 = vadd.f32 %v2039_v4, %v2019_v22 }
 0x290   :  { %2725 = vst [vmem:[#allocation14_spill] sm:$0xff] %v2251_v47  ;;  %2726 = vst [vmem:[#allocation15_spill] sm:$0xff] %v2259_v11  ;;  %v2728_v47 = vld [vmem:[#allocation8_spill] sm:$0xff]  ;;  %v2729_v11 = vld [vmem:[#allocation9_spill] sm:$0xff]  ;;  %v2291_v43 = vadd.f32 %v2039_v4, %v2031_v34  ;;  %v2299_v22 = vadd.f32 %v2039_v4, %v2043_v29  ;;  %v2311_v34 = vadd.f32 %v2039_v4, %v2055_v40  ;;  %v869_v29 = vmax.f32 %v2071_v59, 0.0 }
 0x291   :  { %2727 = vst [vmem:[#allocation16_spill] sm:$0xff] %v2263_v41  ;;  %v2275_v17 = vadd.f32 %v2039_v4, %v2728_v47  ;;  %v2283_v3 = vadd.f32 %v2039_v4, %v2729_v11  ;;  %v2730_v41 = vld [vmem:[#allocation10_spill] sm:$0xff]  ;;  %v2295_v47 = vadd.f32 %v2039_v4, %v2035_v58  ;;  %v2303_v11 = vadd.f32 %v2039_v4, %v2047_v56 }
 0x292   :  { %v2287_v23 = vadd.f32 %v2039_v4, %v2730_v41  ;;  %2731 = vst [vmem:[#allocation17_spill] sm:$0xff] %v2291_v43  ;;  %2733 = vst [vmem:[#allocation19_spill] sm:$0xff] %v2299_v22  ;;  %v2307_v41 = vadd.f32 %v2039_v4, %v2051_v15  ;;  %v866_v43 = vmax.f32 %v2059_v19, 0.0  ;;  %v867_v58 = vmax.f32 %v2063_v2, 0.0 }
 0x293   :  { %2732 = vst [vmem:[#allocation18_spill] sm:$0xff] %v2295_v47  ;;  %2734 = vst [vmem:[#allocation20_spill] sm:$0xff] %v2303_v11  ;;  %v868_v47 = vmax.f32 %v2067_v20, 0.0  ;;  %v870_v22 = vmax.f32 %v2075_v6, 0.0  ;;  %v871_v56 = vmax.f32 %v2079_v13, 0.0  ;;  %v872_v11 = vmax.f32 %v2083_v28, 0.0 }
 0x294   :  { %2735 = vst [vmem:[#allocation21_spill] sm:$0xff] %v2307_v41  ;;  %v873_v15 = vmax.f32 %v2087_v49, 0.0  ;;  %v874_v41 = vmax.f32 %v2091_v55, 0.0  ;;  %v875_v4 = vmax.f32 %v2095_v50, 0.0  ;;  %v876_v40 = vmax.f32 %v2099_v61, 0.0  ;;  %930 = vst.msk [vmem:[%s2638_s5] sm:$0xff] %vm84_vm0, %v866_v43 }
 0x295   :  { %v877_v19 = vmax.f32 %v2103_v7, 0.0  ;;  %931 = vst.msk [vmem:[%s2638_s5 + $0x8] sm:$0xff] %vm84_vm0, %v867_v58  ;;  %932 = vst.msk [vmem:[%s2638_s5 + $0x10] sm:$0xff] %vm84_vm0, %v868_v47  ;;  %v878_v2 = vmax.f32 %v2107_v8, 0.0  ;;  %v879_v20 = vmax.f32 %v2111_v9, 0.0  ;;  %v880_v59 = vmax.f32 %v2115_v10, 0.0 }
 0x296   :  { %933 = vst.msk [vmem:[%s2638_s5 + $0x18] sm:$0xff] %vm84_vm0, %v869_v29  ;;  %v881_v6 = vmax.f32 %v2119_v14, 0.0  ;;  %934 = vst.msk [vmem:[%s2638_s5 + $0x20] sm:$0xff] %vm84_vm0, %v870_v22  ;;  %v882_v13 = vmax.f32 %v2123_v18, 0.0  ;;  %v883_v28 = vmax.f32 %v2127_v21, 0.0  ;;  %v884_v49 = vmax.f32 %v2131_v24, 0.0 }
 0x297   :  { %935 = vst.msk [vmem:[%s2638_s5 + $0x28] sm:$0xff] %vm84_vm0, %v871_v56  ;;  %936 = vst.msk [vmem:[%s2638_s5 + $0x30] sm:$0xff] %vm84_vm0, %v872_v11  ;;  %v885_v55 = vmax.f32 %v2135_v27, 0.0  ;;  %v886_v50 = vmax.f32 %v2139_v30, 0.0  ;;  %v887_v61 = vmax.f32 %v2143_v33, 0.0  ;;  %v888_v7 = vmax.f32 %v2147_v36, 0.0 }
 0x298   :  { %937 = vst.msk [vmem:[%s2638_s5 + $0x38] sm:$0xff] %vm84_vm0, %v873_v15  ;;  %938 = vst.msk [vmem:[%s2638_s5 + $0x40] sm:$0xff] %vm84_vm0, %v874_v41  ;;  %v889_v8 = vmax.f32 %v2151_v39, 0.0  ;;  %v890_v9 = vmax.f32 %v2155_v42, 0.0  ;;  %v891_v10 = vmax.f32 %v2159_v45, 0.0  ;;  %v892_v14 = vmax.f32 %v2163_v48, 0.0 }
 0x299   :  { %939 = vst.msk [vmem:[%s2638_s5 + $0x48] sm:$0xff] %vm84_vm0, %v875_v4  ;;  %940 = vst.msk [vmem:[%s2638_s5 + $0x50] sm:$0xff] %vm84_vm0, %v876_v40  ;;  %v893_v18 = vmax.f32 %v2167_v51, 0.0  ;;  %v894_v21 = vmax.f32 %v2171_v54, 0.0  ;;  %v895_v24 = vmax.f32 %v2175_v57, 0.0  ;;  %v896_v27 = vmax.f32 %v2179_v60, 0.0 }
 0x29a   :  { %941 = vst.msk [vmem:[%s2638_s5 + $0x58] sm:$0xff] %vm84_vm0, %v877_v19  ;;  %942 = vst.msk [vmem:[%s2638_s5 + $0x60] sm:$0xff] %vm84_vm0, %v878_v2  ;;  %v2736_v30 = vld [vmem:[#allocation11_spill] sm:$0xff]  ;;  %v2737_v36 = vld [vmem:[#allocation12_spill] sm:$0xff]  ;;  %v900_v48 = vmax.f32 %v2195_v35, 0.0  ;;  %v901_v51 = vmax.f32 %v2199_v44, 0.0 }
 0x29b   :  { %943 = vst.msk [vmem:[%s2638_s5 + $0x68] sm:$0xff] %vm84_vm0, %v879_v20  ;;  %944 = vst.msk [vmem:[%s2638_s5 + $0x70] sm:$0xff] %vm84_vm0, %v880_v59  ;;  %v897_v33 = vmax.f32 %v2736_v30, 0.0  ;;  %v898_v39 = vmax.f32 %v2737_v36, 0.0  ;;  %v2738_v42 = vld [vmem:[#allocation13_spill] sm:$0xff]  ;;  %v902_v54 = vmax.f32 %v2203_v53, 0.0 }
 0x29c   :  { %945 = vst.msk [vmem:[%s2638_s5 + $0x78] sm:$0xff] %vm84_vm0, %v881_v6  ;;  %946 = vst.msk [vmem:[%s2638_s5 + $0x80] sm:$0xff] %vm84_vm0, %v882_v13  ;;  %v899_v45 = vmax.f32 %v2738_v42, 0.0  ;;  %v903_v57 = vmax.f32 %v2207_v37, 0.0  ;;  %v904_v60 = vmax.f32 %v2211_v38, 0.0  ;;  %v905_v35 = vmax.f32 %v2215_v26, 0.0 }
 0x29d   :  { %947 = vst.msk [vmem:[%s2638_s5 + $0x88] sm:$0xff] %vm84_vm0, %v883_v28  ;;  %948 = vst.msk [vmem:[%s2638_s5 + $0x90] sm:$0xff] %vm84_vm0, %v884_v49  ;;  %v906_v44 = vmax.f32 %v2219_v46, 0.0  ;;  %v907_v53 = vmax.f32 %v2223_v12, 0.0  ;;  %v908_v37 = vmax.f32 %v2227_v0, 0.0  ;;  %v909_v38 = vmax.f32 %v2231_v5, 0.0 }
 0x29e   :  { %949 = vst.msk [vmem:[%s2638_s5 + $0x98] sm:$0xff] %vm84_vm0, %v885_v55  ;;  %950 = vst.msk [vmem:[%s2638_s5 + $0xa0] sm:$0xff] %vm84_vm0, %v886_v50  ;;  %v910_v26 = vmax.f32 %v2235_v16, 0.0  ;;  %v911_v46 = vmax.f32 %v2239_v63, 0.0  ;;  %v912_v12 = vmax.f32 %v2243_v32, 0.0  ;;  %v913_v0 = vmax.f32 %v2247_v25, 0.0 }
 0x29f   :  { %951 = vst.msk [vmem:[%s2638_s5 + $0xa8] sm:$0xff] %vm84_vm0, %v887_v61  ;;  %952 = vst.msk [vmem:[%s2638_s5 + $0xb0] sm:$0xff] %vm84_vm0, %v888_v7  ;;  %v2739_v5 = vld [vmem:[#allocation14_spill] sm:$0xff]  ;;  %v915_v63 = vmax.f32 %v2255_v52, 0.0  ;;  %v2740_v32 = vld [vmem:[#allocation15_spill] sm:$0xff]  ;;  %v918_v52 = vmax.f32 %v2267_v62, 0.0 }
 0x2a0   :  { %953 = vst.msk [vmem:[%s2638_s5 + $0xb8] sm:$0xff] %vm84_vm0, %v889_v8  ;;  %954 = vst.msk [vmem:[%s2638_s5 + $0xc0] sm:$0xff] %vm84_vm0, %v890_v9  ;;  %v914_v16 = vmax.f32 %v2739_v5, 0.0  ;;  %v916_v25 = vmax.f32 %v2740_v32, 0.0  ;;  %v2741_v43 = vld [vmem:[#allocation16_spill] sm:$0xff]  ;;  %v919_v22 = vmax.f32 %v2271_v1, 0.0 }
 0x2a1   :  { %955 = vst.msk [vmem:[%s2638_s5 + $0xc8] sm:$0xff] %vm84_vm0, %v891_v10  ;;  %956 = vst.msk [vmem:[%s2638_s5 + $0xd0] sm:$0xff] %vm84_vm0, %v892_v14  ;;  %v917_v47 = vmax.f32 %v2741_v43, 0.0  ;;  %v920_v11 = vmax.f32 %v2275_v17, 0.0  ;;  %v921_v41 = vmax.f32 %v2279_v31, 0.0  ;;  %v922_v62 = vmax.f32 %v2283_v3, 0.0 }
 0x2a2   :  { %957 = vst.msk [vmem:[%s2638_s5 + $0xd8] sm:$0xff] %vm84_vm0, %v893_v18  ;;  %958 = vst.msk [vmem:[%s2638_s5 + $0xe0] sm:$0xff] %vm84_vm0, %v894_v21  ;;  %v923_v1 = vmax.f32 %v2287_v23, 0.0  ;;  %v2742_v17 = vld [vmem:[#allocation17_spill] sm:$0xff]  ;;  %v2743_v58 = vld [vmem:[#allocation18_spill] sm:$0xff]  ;;  %v929_v19 = vmax.f32 %v2311_v34, 0.0 }
 0x2a3   :  { %959 = vst.msk [vmem:[%s2638_s5 + $0xe8] sm:$0xff] %vm84_vm0, %v895_v24  ;;  %960 = vst.msk [vmem:[%s2638_s5 + $0xf0] sm:$0xff] %vm84_vm0, %v896_v27  ;;  %v924_v31 = vmax.f32 %v2742_v17, 0.0  ;;  %v925_v29 = vmax.f32 %v2743_v58, 0.0  ;;  %v2744_v3 = vld [vmem:[#allocation19_spill] sm:$0xff]  ;;  %v2745_v56 = vld [vmem:[#allocation20_spill] sm:$0xff] }
 0x2a4   :  { %961 = vst.msk [vmem:[%s2638_s5 + $0xf8] sm:$0xff] %vm84_vm0, %v897_v33  ;;  %962 = vst.msk [vmem:[%s2638_s5 + $0x100] sm:$0xff] %vm84_vm0, %v898_v39  ;;  %v926_v23 = vmax.f32 %v2744_v3, 0.0  ;;  %v927_v15 = vmax.f32 %v2745_v56, 0.0  ;;  %v2746_v4 = vld [vmem:[#allocation21_spill] sm:$0xff] }
 0x2a5   :  { %963 = vst.msk [vmem:[%s2638_s5 + $0x108] sm:$0xff] %vm84_vm0, %v899_v45  ;;  %964 = vst.msk [vmem:[%s2638_s5 + $0x110] sm:$0xff] %vm84_vm0, %v900_v48  ;;  %v928_v40 = vmax.f32 %v2746_v4, 0.0 }
 0x2a6   :  { %965 = vst.msk [vmem:[%s2638_s5 + $0x118] sm:$0xff] %vm84_vm0, %v901_v51  ;;  %966 = vst.msk [vmem:[%s2638_s5 + $0x120] sm:$0xff] %vm84_vm0, %v902_v54 }
 0x2a7   :  { %967 = vst.msk [vmem:[%s2638_s5 + $0x128] sm:$0xff] %vm84_vm0, %v903_v57  ;;  %968 = vst.msk [vmem:[%s2638_s5 + $0x130] sm:$0xff] %vm84_vm0, %v904_v60 }
 0x2a8   :  { %969 = vst.msk [vmem:[%s2638_s5 + $0x138] sm:$0xff] %vm84_vm0, %v905_v35  ;;  %970 = vst.msk [vmem:[%s2638_s5 + $0x140] sm:$0xff] %vm84_vm0, %v906_v44 }
 0x2a9   :  { %971 = vst.msk [vmem:[%s2638_s5 + $0x148] sm:$0xff] %vm84_vm0, %v907_v53  ;;  %972 = vst.msk [vmem:[%s2638_s5 + $0x150] sm:$0xff] %vm84_vm0, %v908_v37 }
 0x2aa   :  { %973 = vst.msk [vmem:[%s2638_s5 + $0x158] sm:$0xff] %vm84_vm0, %v909_v38  ;;  %974 = vst.msk [vmem:[%s2638_s5 + $0x160] sm:$0xff] %vm84_vm0, %v910_v26 }
 0x2ab   :  { %975 = vst.msk [vmem:[%s2638_s5 + $0x168] sm:$0xff] %vm84_vm0, %v911_v46  ;;  %976 = vst.msk [vmem:[%s2638_s5 + $0x170] sm:$0xff] %vm84_vm0, %v912_v12 }
 0x2ac   :  { %977 = vst.msk [vmem:[%s2638_s5 + $0x178] sm:$0xff] %vm84_vm0, %v913_v0  ;;  %978 = vst.msk [vmem:[%s2638_s5 + $0x180] sm:$0xff] %vm84_vm0, %v914_v16 }
 0x2ad   :  { %979 = vst.msk [vmem:[%s2638_s5 + $0x188] sm:$0xff] %vm84_vm0, %v915_v63  ;;  %980 = vst.msk [vmem:[%s2638_s5 + $0x190] sm:$0xff] %vm84_vm0, %v916_v25 }
 0x2ae   :  { %981 = vst.msk [vmem:[%s2638_s5 + $0x198] sm:$0xff] %vm84_vm0, %v917_v47  ;;  %982 = vst.msk [vmem:[%s2638_s5 + $0x1a0] sm:$0xff] %vm84_vm0, %v918_v52 }
 0x2af   :  { %983 = vst.msk [vmem:[%s2638_s5 + $0x1a8] sm:$0xff] %vm84_vm0, %v919_v22  ;;  %984 = vst.msk [vmem:[%s2638_s5 + $0x1b0] sm:$0xff] %vm84_vm0, %v920_v11 }
 0x2b0   :  { %985 = vst.msk [vmem:[%s2638_s5 + $0x1b8] sm:$0xff] %vm84_vm0, %v921_v41  ;;  %986 = vst.msk [vmem:[%s2638_s5 + $0x1c0] sm:$0xff] %vm84_vm0, %v922_v62 }
 0x2b1   :  { %987 = vst.msk [vmem:[%s2638_s5 + $0x1c8] sm:$0xff] %vm84_vm0, %v923_v1  ;;  %988 = vst.msk [vmem:[%s2638_s5 + $0x1d0] sm:$0xff] %vm84_vm0, %v924_v31 }
 0x2b2   :  { %989 = vst.msk [vmem:[%s2638_s5 + $0x1d8] sm:$0xff] %vm84_vm0, %v925_v29  ;;  %990 = vst.msk [vmem:[%s2638_s5 + $0x1e0] sm:$0xff] %vm84_vm0, %v926_v23 }
 0x2b3   :  { %991 = vst.msk [vmem:[%s2638_s5 + $0x1e8] sm:$0xff] %vm84_vm0, %v927_v15  ;;  %992 = vst.msk [vmem:[%s2638_s5 + $0x1f0] sm:$0xff] %vm84_vm0, %v928_v40 }
 0x2b4   :  { %993 = vst.msk [vmem:[%s2638_s5 + $0x1f8] sm:$0xff] %vm84_vm0, %v929_v19 }

</bundles_post_ra>
